<compile_context>
chip_gen: v7x
topology: tpu7x:2x2x1
jax: 0.10.0
libtpu: 0.0.40
codegen_flags: <defaults>
</compile_context>

<pallas_src>
import functools

import jax
import jax.numpy as jnp
from jax import lax
from jax.experimental import pallas as pl
from jax.experimental.pallas import tpu as pltpu


def _round_up(x, m):
    return ((x + m - 1) // m) * m


def _conv_mobile_kernel(x_ref, mask_ref, w1_ref, b1_ref, w2_ref, b2_ref,
                        w3_ref, b3_ref, o_ref, y1_ref,
                        *, K, stride, Wq, HqWq, Lacc, use_residual, res_off):
    # x_ref   : (1, Cin, Lx)   pre-padded, phase-decomposed, flat-spatial input
    # mask_ref: (1, Lx)        1.0 at interior pixels, 0.0 at conv padding
    # y1_ref  : (Cmid, Lx)     VMEM scratch holding stage-1 output (padded layout)
    # o_ref   : (1, Cout, Lacc)
    Cmid = w2_ref.shape[2]
    x = x_ref[0]                                          # (Cin, Lx)

    # ---- stage 1: 1x1 conv (BN scale folded into w1) + masked BN bias ----
    y1 = jnp.dot(w1_ref[...], x, preferred_element_type=jnp.float32)
    y1 = y1 + b1_ref[...] * mask_ref[...]                 # bias only on interior
    y1_ref[...] = y1.astype(y1_ref.dtype)

    # ---- stage 2: KxK conv, stride s (phase-decomposed -> contiguous slabs) ----
    acc = jnp.zeros((Cmid, Lacc), jnp.float32)
    for ky in range(K):
        for kx in range(K):
            p_idx = (ky % stride) * stride + (kx % stride)
            col0 = p_idx * HqWq + (ky // stride) * Wq + (kx // stride)
            slab = y1_ref[:, pl.ds(col0, Lacc)]           # (Cmid, Lacc), contiguous
            acc = acc + jnp.dot(w2_ref[ky, kx], slab,
                                preferred_element_type=jnp.float32)
    y2 = acc + b2_ref[...]

    # ---- stage 3: 1x1 conv + BN bias + ReLU6 ----
    y3 = jnp.dot(w3_ref[...], y2.astype(w3_ref.dtype),
                 preferred_element_type=jnp.float32)
    y3 = y3 + b3_ref[...]
    y3 = jnp.clip(y3, 0.0, 6.0)

    if use_residual:
        y3 = y3 + x[:, res_off:res_off + Lacc].astype(jnp.float32)

    o_ref[0] = y3.astype(o_ref.dtype)


def conv_mobile_block(x_nchw, params, *, kernel_size, stride,
                      compute_dtype=jnp.float32):
    """x_nchw: (N, Cin, H, W) float32 — same convention as the PyTorch module."""
    N, Cin, H, W = x_nchw.shape
    K, s = kernel_size, stride
    p = K // 2
    Cmid = params["w1"].shape[1]
    Cout = params["w3"].shape[1]
    Hout = (H + 2 * p - K) // s + 1
    Wout = (W + 2 * p - K) // s + 1
    use_residual = (Cin == Cout) and (s == 1)

    # padded / phase-decomposed geometry
    Hp, Wp = H + 2 * p, W + 2 * p
    Hq, Wq = -(-Hp // s), -(-Wp // s)          # ceil division
    Hpp, Wpp = Hq * s, Wq * s
    HqWq = Hq * Wq
    d_max = (K - 1) // s
    Lx = s * s * HqWq
    margin = d_max * Wq + d_max                # keeps every tap slab read in-bounds
    Lx_alloc = _round_up(Lx + margin, 128)
    Lacc = Hout * Wq                           # output rows use Wq as row stride
    res_off = p * Wq + p                       # only used when s == 1

    # ---- host-side layout prep (pure XLA, cheap) ----
    xp = jnp.pad(x_nchw, ((0, 0), (0, 0), (p, Hpp - H - p), (p, Wpp - W - p)))
    xph = xp.reshape(N, Cin, Hq, s, Wq, s).transpose(0, 1, 3, 5, 2, 4)
    xph = xph.reshape(N, Cin, Lx)
    xph = jnp.pad(xph, ((0, 0), (0, 0), (0, Lx_alloc - Lx))).astype(compute_dtype)

    mask2d = jnp.pad(jnp.ones((H, W), jnp.float32),
                     ((p, Hpp - H - p), (p, Wpp - W - p)))
    mask = mask2d.reshape(Hq, s, Wq, s).transpose(1, 3, 0, 2).reshape(Lx)
    mask = jnp.pad(mask, (0, Lx_alloc - Lx))[None, :]                  # (1, Lx_alloc)

    # fold BN scales into weights; transpose to (C_out, C_in) layout
    w1f = (params["s1"][0][:, None] * params["w1"].T).astype(compute_dtype)
    w2f = (params["w2"] * params["s2"][0][None, None, None, :])
    w2f = jnp.transpose(w2f, (0, 1, 3, 2)).astype(compute_dtype)       # (K,K,Cmid,Cmid)
    w3f = (params["s3"][0][:, None] * params["w3"].T).astype(compute_dtype)
    b1 = params["b1"].reshape(Cmid, 1).astype(jnp.float32)
    b2 = params["b2"].reshape(Cmid, 1).astype(jnp.float32)
    b3 = params["b3"].reshape(Cout, 1).astype(jnp.float32)

    kernel = functools.partial(_conv_mobile_kernel, K=K, stride=s, Wq=Wq,
                               HqWq=HqWq, Lacc=Lacc, use_residual=use_residual,
                               res_off=res_off)

    itemsize = jnp.dtype(compute_dtype).itemsize
    vmem_est = (2 * Cin * Lx_alloc * itemsize        # input block, double-buffered
                + 2 * Cout * Lacc * 4                # output block, double-buffered
                + Cmid * Lx_alloc * itemsize         # y1 scratch
                + Lx_alloc * 4                       # mask
                + (Cmid * Cin + K * K * Cmid * Cmid + Cout * Cmid) * itemsize
                + (2 * Cmid + Cout) * 4)
    vmem_limit = int(min(max(4 * vmem_est, 32 * 1024 * 1024), 64 * 1024 * 1024))

    out_flat = pl.pallas_call(
        kernel,
        out_shape=jax.ShapeDtypeStruct((N, Cout, Lacc), jnp.float32),
        grid_spec=pltpu.PrefetchScalarGridSpec(
            num_scalar_prefetch=0,
            grid=(N,),
            in_specs=[
                pl.BlockSpec((1, Cin, Lx_alloc), lambda n: (n, 0, 0)),
                pl.BlockSpec((1, Lx_alloc), lambda n: (0, 0)),
                pl.BlockSpec((Cmid, Cin), lambda n: (0, 0)),
                pl.BlockSpec((Cmid, 1), lambda n: (0, 0)),
                pl.BlockSpec((K, K, Cmid, Cmid), lambda n: (0, 0, 0, 0)),
                pl.BlockSpec((Cmid, 1), lambda n: (0, 0)),
                pl.BlockSpec((Cout, Cmid), lambda n: (0, 0)),
                pl.BlockSpec((Cout, 1), lambda n: (0, 0)),
            ],
            out_specs=pl.BlockSpec((1, Cout, Lacc), lambda n: (n, 0, 0)),
            scratch_shapes=[pltpu.VMEM((Cmid, Lx_alloc), compute_dtype)],
        ),
        compiler_params=pltpu.CompilerParams(
            dimension_semantics=("parallel",),
            vmem_limit_bytes=vmem_limit),
    )(xph, mask, w1f, b1, w2f, b2, w3f, b3)

    # un-pad: valid output (oy, ox) lives at flat column oy*Wq + ox
    out = out_flat.reshape(N, Cout, Hout, Wq)[:, :, :, :Wout]
    return out


def init_params(key, in_ch, out_ch, K):
    """Deterministic synthetic params. Conv weights stored as (..., Cin, Cout);
    BatchNorm folded into per-channel (scale, bias)."""
    mid = in_ch + out_ch // 2
    keys = jax.random.split(key, 15)

    def bn_fold(k0, k1, k2, k3, c):
        gamma = jax.random.uniform(k0, (c,), minval=0.5, maxval=1.5)
        beta = jax.random.normal(k1, (c,)) * 0.1
        mean = jax.random.normal(k2, (c,)) * 0.1
        var = jax.random.uniform(k3, (c,), minval=0.5, maxval=1.5)
        scale = gamma / jnp.sqrt(var + 1e-5)
        bias = beta - mean * scale
        return (scale.reshape(1, c).astype(jnp.float32),
                bias.reshape(1, c).astype(jnp.float32))

    w1 = (jax.random.normal(keys[0], (in_ch, mid)) * 0.1).astype(jnp.float32)
    s1, b1 = bn_fold(keys[1], keys[2], keys[3], keys[4], mid)
    w2 = (jax.random.normal(keys[5], (K, K, mid, mid)) * 0.1).astype(jnp.float32)
    s2, b2 = bn_fold(keys[6], keys[7], keys[8], keys[9], mid)
    w3 = (jax.random.normal(keys[10], (mid, out_ch)) * 0.1).astype(jnp.float32)
    s3, b3 = bn_fold(keys[11], keys[12], keys[13], keys[14], out_ch)
    return dict(w1=w1, s1=s1, b1=b1, w2=w2, s2=s2, b2=b2, w3=w3, s3=s3, b3=b3)


def ref_forward(x_nchw, p, K, stride):
    """Pure-JAX reference (high precision) of the module forward semantics."""
    N, Cin, H, W = x_nchw.shape
    Cout = p["w3"].shape[1]
    pad = K // 2
    Hout = (H + 2 * pad - K) // stride + 1
    Wout = (W + 2 * pad - K) // stride + 1
    use_residual = (Cin == Cout) and (stride == 1)
    hp = lax.Precision.HIGHEST

    x = jnp.transpose(x_nchw, (0, 2, 3, 1)).astype(jnp.float32)
    y1 = jnp.einsum("nhwc,cm->nhwm", x, p["w1"], precision=hp)
    y1 = y1 * p["s1"][0] + p["b1"][0]
    y1p = jnp.pad(y1, ((0, 0), (pad, pad), (pad, pad), (0, 0)))
    acc = jnp.zeros((N, Hout, Wout, p["w2"].shape[-1]), jnp.float32)
    for ky in range(K):
        for kx in range(K):
            patch = y1p[:, ky:ky + Hout * stride:stride,
                        kx:kx + Wout * stride:stride, :]
            acc = acc + jnp.einsum("nhwc,cm->nhwm", patch, p["w2"][ky, kx],
                                   precision=hp)
    y2 = acc * p["s2"][0] + p["b2"][0]
    y3 = jnp.einsum("nhwc,cm->nhwm", y2, p["w3"], precision=hp)
    y3 = y3 * p["s3"][0] + p["b3"][0]
    y3 = jnp.clip(y3, 0.0, 6.0)
    if use_residual:
        y3 = y3 + x
    return jnp.transpose(y3, (0, 3, 1, 2))


def _run_case(name, *, N, Cin, Cout, H, W, K, stride, compute_dtype, tol, key):
    k_x, k_p = jax.random.split(key)
    x = jax.random.normal(k_x, (N, Cin, H, W), dtype=jnp.float32)
    params = init_params(k_p, Cin, Cout, K)

    out = conv_mobile_block(x, params, kernel_size=K, stride=stride,
                            compute_dtype=compute_dtype)
    out = jax.block_until_ready(out)

    ref = ref_forward(x, params, K, stride)
    assert out.shape == ref.shape, (name, out.shape, ref.shape)
    max_err = float(jnp.max(jnp.abs(out - ref)))
    if max_err > tol:
        raise ValueError(f"{name}: kernel mismatch vs reference, "
                         f"max abs err {max_err} > {tol}")


if __name__ == "__main__":
    key = jax.random.PRNGKey(0)
    k1, k2, k3 = jax.random.split(key, 3)

    # residual path (in == out, stride 1), fp32 matmuls
    _run_case("s1_residual_f32", N=2, Cin=16, Cout=16, H=16, W=16, K=3,
              stride=1, compute_dtype=jnp.float32, tol=5e-2, key=k1)

    # LitePose-style downsampling block (K=7, stride=2, no residual), fp32
    _run_case("s2_k7_f32", N=2, Cin=16, Cout=24, H=16, W=16, K=7,
              stride=2, compute_dtype=jnp.float32, tol=5e-2, key=k2)

    # bf16 matmul inputs (f32 accumulation) — v6e/v7x MXU fast path
    _run_case("s1_residual_bf16", N=2, Cin=16, Cout=16, H=16, W=16, K=3,
              stride=1, compute_dtype=jnp.bfloat16, tol=2.5e-1, key=k3)

    print("KERNEL_OK")
</pallas_src>

<mosaic_0001>
module attributes {stable_mosaic.version = 11 : i64} {
  func.func @_conv_mobile_kernel(%arg0: i32, %arg1: memref<1x16x384xf32, #tpu.memory_space<vmem>>, %arg2: memref<1x384xf32, #tpu.memory_space<vmem>>, %arg3: memref<24x16xf32, #tpu.memory_space<vmem>>, %arg4: memref<24x1xf32, #tpu.memory_space<vmem>>, %arg5: memref<3x3x24x24xf32, #tpu.memory_space<vmem>>, %arg6: memref<24x1xf32, #tpu.memory_space<vmem>>, %arg7: memref<16x24xf32, #tpu.memory_space<vmem>>, %arg8: memref<16x1xf32, #tpu.memory_space<vmem>>, %arg9: memref<1x16x288xf32, #tpu.memory_space<vmem>>, %arg10: memref<24x384xf32, #tpu.memory_space<vmem>>) attributes {dimension_semantics = [#tpu.dimension_semantics<parallel>], iteration_bounds = array<i64: 2>, scalar_prefetch = 0 : i64, scratch_operands = 1 : i64, tpu.core_type = #tpu.core_type<tc>, window_params = [{transform_indices = @transform_0, window_bounds = array<i64: 1, 16, 384>}, {pipeline_mode = #tpu.pipeline_mode<synchronous>, transform_indices = @transform_1, window_bounds = array<i64: 1, 384>}, {pipeline_mode = #tpu.pipeline_mode<synchronous>, transform_indices = @transform_2, window_bounds = array<i64: 24, 16>}, {pipeline_mode = #tpu.pipeline_mode<synchronous>, transform_indices = @transform_3, window_bounds = array<i64: 24, 1>}, {pipeline_mode = #tpu.pipeline_mode<synchronous>, transform_indices = @transform_4, window_bounds = array<i64: 3, 3, 24, 24>}, {pipeline_mode = #tpu.pipeline_mode<synchronous>, transform_indices = @transform_5, window_bounds = array<i64: 24, 1>}, {pipeline_mode = #tpu.pipeline_mode<synchronous>, transform_indices = @transform_6, window_bounds = array<i64: 16, 24>}, {pipeline_mode = #tpu.pipeline_mode<synchronous>, transform_indices = @transform_7, window_bounds = array<i64: 16, 1>}, {transform_indices = @transform_8, window_bounds = array<i64: 1, 16, 288>}]} {
    %c0 = arith.constant 0 : index
    %c0_0 = arith.constant 0 : index
    %c0_1 = arith.constant 0 : index
    %0 = vector.load %arg1[%c0, %c0_0, %c0_1] : memref<1x16x384xf32, #tpu.memory_space<vmem>>, vector<1x16x384xf32>
    %1 = vector.shape_cast %0 : vector<1x16x384xf32> to vector<16x384xf32>
    %c0_2 = arith.constant 0 : index
    %c0_3 = arith.constant 0 : index
    %2 = vector.load %arg3[%c0_2, %c0_3] : memref<24x16xf32, #tpu.memory_space<vmem>>, vector<24x16xf32>
    %cst = arith.constant dense<0.000000e+00> : vector<24x384xf32>
    %3 = tpu.matmul %2, %1, %cst {dimension_numbers = #tpu.dot_dimension_numbers<[1], [0], [0], [1], [0, 0, 1, 1], [], []>} : vector<24x16xf32>, vector<16x384xf32>, vector<24x384xf32> -> vector<24x384xf32>
    %c0_4 = arith.constant 0 : index
    %c0_5 = arith.constant 0 : index
    %4 = vector.load %arg4[%c0_4, %c0_5] : memref<24x1xf32, #tpu.memory_space<vmem>>, vector<24x1xf32>
    %c0_6 = arith.constant 0 : index
    %c0_7 = arith.constant 0 : index
    %5 = vector.load %arg2[%c0_6, %c0_7] : memref<1x384xf32, #tpu.memory_space<vmem>>, vector<1x384xf32>
    %6 = vector.broadcast %4 : vector<24x1xf32> to vector<24x384xf32>
    %7 = vector.broadcast %5 : vector<1x384xf32> to vector<24x384xf32>
    %8 = arith.mulf %6, %7 : vector<24x384xf32>
    %9 = arith.addf %3, %8 : vector<24x384xf32>
    %c0_8 = arith.constant 0 : index
    %c0_9 = arith.constant 0 : index
    %10 = vector.load %arg10[%c0_8, %c0_9] : memref<24x384xf32, #tpu.memory_space<vmem>>, vector<24x384xf32>
    tpu.vector_store %arg10[%c0_8, %c0_9], %9 {strides = array<i32>} : memref<24x384xf32, #tpu.memory_space<vmem>>, vector<24x384xf32>,
    %cst_10 = arith.constant 0.000000e+00 : f32
    %11 = vector.broadcast %cst_10 : f32 to vector<24x288xf32>
    %c0_11 = arith.constant 0 : index
    %c0_12 = arith.constant 0 : index
    %12 = vector.load %arg10[%c0_11, %c0_12] : memref<24x384xf32, #tpu.memory_space<vmem>>, vector<24x288xf32>
    %c0_13 = arith.constant 0 : index
    %c0_14 = arith.constant 0 : index
    %c0_15 = arith.constant 0 : index
    %c0_16 = arith.constant 0 : index
    %13 = vector.load %arg5[%c0_13, %c0_14, %c0_15, %c0_16] : memref<3x3x24x24xf32, #tpu.memory_space<vmem>>, vector<1x1x24x24xf32>
    %14 = vector.shape_cast %13 : vector<1x1x24x24xf32> to vector<24x24xf32>
    %cst_17 = arith.constant dense<0.000000e+00> : vector<24x288xf32>
    %15 = tpu.matmul %14, %12, %cst_17 {dimension_numbers = #tpu.dot_dimension_numbers<[1], [0], [0], [1], [0, 0, 1, 1], [], []>} : vector<24x24xf32>, vector<24x288xf32>, vector<24x288xf32> -> vector<24x288xf32>
    %16 = arith.addf %11, %15 : vector<24x288xf32>
    %c0_18 = arith.constant 0 : index
    %c1 = arith.constant 1 : index
    %17 = vector.load %arg10[%c0_18, %c1] : memref<24x384xf32, #tpu.memory_space<vmem>>, vector<24x288xf32>
    %c0_19 = arith.constant 0 : index
    %c1_20 = arith.constant 1 : index
    %c0_21 = arith.constant 0 : index
    %c0_22 = arith.constant 0 : index
    %18 = vector.load %arg5[%c0_19, %c1_20, %c0_21, %c0_22] : memref<3x3x24x24xf32, #tpu.memory_space<vmem>>, vector<1x1x24x24xf32>
    %19 = vector.shape_cast %18 : vector<1x1x24x24xf32> to vector<24x24xf32>
    %cst_23 = arith.constant dense<0.000000e+00> : vector<24x288xf32>
    %20 = tpu.matmul %19, %17, %cst_23 {dimension_numbers = #tpu.dot_dimension_numbers<[1], [0], [0], [1], [0, 0, 1, 1], [], []>} : vector<24x24xf32>, vector<24x288xf32>, vector<24x288xf32> -> vector<24x288xf32>
    %21 = arith.addf %16, %20 : vector<24x288xf32>
    %c0_24 = arith.constant 0 : index
    %c2 = arith.constant 2 : index
    %22 = vector.load %arg10[%c0_24, %c2] : memref<24x384xf32, #tpu.memory_space<vmem>>, vector<24x288xf32>
    %c0_25 = arith.constant 0 : index
    %c2_26 = arith.constant 2 : index
    %c0_27 = arith.constant 0 : index
    %c0_28 = arith.constant 0 : index
    %23 = vector.load %arg5[%c0_25, %c2_26, %c0_27, %c0_28] : memref<3x3x24x24xf32, #tpu.memory_space<vmem>>, vector<1x1x24x24xf32>
    %24 = vector.shape_cast %23 : vector<1x1x24x24xf32> to vector<24x24xf32>
    %cst_29 = arith.constant dense<0.000000e+00> : vector<24x288xf32>
    %25 = tpu.matmul %24, %22, %cst_29 {dimension_numbers = #tpu.dot_dimension_numbers<[1], [0], [0], [1], [0, 0, 1, 1], [], []>} : vector<24x24xf32>, vector<24x288xf32>, vector<24x288xf32> -> vector<24x288xf32>
    %26 = arith.addf %21, %25 : vector<24x288xf32>
    %c0_30 = arith.constant 0 : index
    %c18 = arith.constant 18 : index
    %27 = vector.load %arg10[%c0_30, %c18] : memref<24x384xf32, #tpu.memory_space<vmem>>, vector<24x288xf32>
    %c1_31 = arith.constant 1 : index
    %c0_32 = arith.constant 0 : index
    %c0_33 = arith.constant 0 : index
    %c0_34 = arith.constant 0 : index
    %28 = vector.load %arg5[%c1_31, %c0_32, %c0_33, %c0_34] : memref<3x3x24x24xf32, #tpu.memory_space<vmem>>, vector<1x1x24x24xf32>
    %29 = vector.shape_cast %28 : vector<1x1x24x24xf32> to vector<24x24xf32>
    %cst_35 = arith.constant dense<0.000000e+00> : vector<24x288xf32>
    %30 = tpu.matmul %29, %27, %cst_35 {dimension_numbers = #tpu.dot_dimension_numbers<[1], [0], [0], [1], [0, 0, 1, 1], [], []>} : vector<24x24xf32>, vector<24x288xf32>, vector<24x288xf32> -> vector<24x288xf32>
    %31 = arith.addf %26, %30 : vector<24x288xf32>
    %c0_36 = arith.constant 0 : index
    %c19 = arith.constant 19 : index
    %32 = vector.load %arg10[%c0_36, %c19] : memref<24x384xf32, #tpu.memory_space<vmem>>, vector<24x288xf32>
    %c1_37 = arith.constant 1 : index
    %c1_38 = arith.constant 1 : index
    %c0_39 = arith.constant 0 : index
    %c0_40 = arith.constant 0 : index
    %33 = vector.load %arg5[%c1_37, %c1_38, %c0_39, %c0_40] : memref<3x3x24x24xf32, #tpu.memory_space<vmem>>, vector<1x1x24x24xf32>
    %34 = vector.shape_cast %33 : vector<1x1x24x24xf32> to vector<24x24xf32>
    %cst_41 = arith.constant dense<0.000000e+00> : vector<24x288xf32>
    %35 = tpu.matmul %34, %32, %cst_41 {dimension_numbers = #tpu.dot_dimension_numbers<[1], [0], [0], [1], [0, 0, 1, 1], [], []>} : vector<24x24xf32>, vector<24x288xf32>, vector<24x288xf32> -> vector<24x288xf32>
    %36 = arith.addf %31, %35 : vector<24x288xf32>
    %c0_42 = arith.constant 0 : index
    %c20 = arith.constant 20 : index
    %37 = vector.load %arg10[%c0_42, %c20] : memref<24x384xf32, #tpu.memory_space<vmem>>, vector<24x288xf32>
    %c1_43 = arith.constant 1 : index
    %c2_44 = arith.constant 2 : index
    %c0_45 = arith.constant 0 : index
    %c0_46 = arith.constant 0 : index
    %38 = vector.load %arg5[%c1_43, %c2_44, %c0_45, %c0_46] : memref<3x3x24x24xf32, #tpu.memory_space<vmem>>, vector<1x1x24x24xf32>
    %39 = vector.shape_cast %38 : vector<1x1x24x24xf32> to vector<24x24xf32>
    %cst_47 = arith.constant dense<0.000000e+00> : vector<24x288xf32>
    %40 = tpu.matmul %39, %37, %cst_47 {dimension_numbers = #tpu.dot_dimension_numbers<[1], [0], [0], [1], [0, 0, 1, 1], [], []>} : vector<24x24xf32>, vector<24x288xf32>, vector<24x288xf32> -> vector<24x288xf32>
    %41 = arith.addf %36, %40 : vector<24x288xf32>
    %c0_48 = arith.constant 0 : index
    %c36 = arith.constant 36 : index
    %42 = vector.load %arg10[%c0_48, %c36] : memref<24x384xf32, #tpu.memory_space<vmem>>, vector<24x288xf32>
    %c2_49 = arith.constant 2 : index
    %c0_50 = arith.constant 0 : index
    %c0_51 = arith.constant 0 : index
    %c0_52 = arith.constant 0 : index
    %43 = vector.load %arg5[%c2_49, %c0_50, %c0_51, %c0_52] : memref<3x3x24x24xf32, #tpu.memory_space<vmem>>, vector<1x1x24x24xf32>
    %44 = vector.shape_cast %43 : vector<1x1x24x24xf32> to vector<24x24xf32>
    %cst_53 = arith.constant dense<0.000000e+00> : vector<24x288xf32>
    %45 = tpu.matmul %44, %42, %cst_53 {dimension_numbers = #tpu.dot_dimension_numbers<[1], [0], [0], [1], [0, 0, 1, 1], [], []>} : vector<24x24xf32>, vector<24x288xf32>, vector<24x288xf32> -> vector<24x288xf32>
    %46 = arith.addf %41, %45 : vector<24x288xf32>
    %c0_54 = arith.constant 0 : index
    %c37 = arith.constant 37 : index
    %47 = vector.load %arg10[%c0_54, %c37] : memref<24x384xf32, #tpu.memory_space<vmem>>, vector<24x288xf32>
    %c2_55 = arith.constant 2 : index
    %c1_56 = arith.constant 1 : index
    %c0_57 = arith.constant 0 : index
    %c0_58 = arith.constant 0 : index
    %48 = vector.load %arg5[%c2_55, %c1_56, %c0_57, %c0_58] : memref<3x3x24x24xf32, #tpu.memory_space<vmem>>, vector<1x1x24x24xf32>
    %49 = vector.shape_cast %48 : vector<1x1x24x24xf32> to vector<24x24xf32>
    %cst_59 = arith.constant dense<0.000000e+00> : vector<24x288xf32>
    %50 = tpu.matmul %49, %47, %cst_59 {dimension_numbers = #tpu.dot_dimension_numbers<[1], [0], [0], [1], [0, 0, 1, 1], [], []>} : vector<24x24xf32>, vector<24x288xf32>, vector<24x288xf32> -> vector<24x288xf32>
    %51 = arith.addf %46, %50 : vector<24x288xf32>
    %c0_60 = arith.constant 0 : index
    %c38 = arith.constant 38 : index
    %52 = vector.load %arg10[%c0_60, %c38] : memref<24x384xf32, #tpu.memory_space<vmem>>, vector<24x288xf32>
    %c2_61 = arith.constant 2 : index
    %c2_62 = arith.constant 2 : index
    %c0_63 = arith.constant 0 : index
    %c0_64 = arith.constant 0 : index
    %53 = vector.load %arg5[%c2_61, %c2_62, %c0_63, %c0_64] : memref<3x3x24x24xf32, #tpu.memory_space<vmem>>, vector<1x1x24x24xf32>
    %54 = vector.shape_cast %53 : vector<1x1x24x24xf32> to vector<24x24xf32>
    %cst_65 = arith.constant dense<0.000000e+00> : vector<24x288xf32>
    %55 = tpu.matmul %54, %52, %cst_65 {dimension_numbers = #tpu.dot_dimension_numbers<[1], [0], [0], [1], [0, 0, 1, 1], [], []>} : vector<24x24xf32>, vector<24x288xf32>, vector<24x288xf32> -> vector<24x288xf32>
    %56 = arith.addf %51, %55 : vector<24x288xf32>
    %c0_66 = arith.constant 0 : index
    %c0_67 = arith.constant 0 : index
    %57 = vector.load %arg6[%c0_66, %c0_67] : memref<24x1xf32, #tpu.memory_space<vmem>>, vector<24x1xf32>
    %58 = vector.broadcast %57 : vector<24x1xf32> to vector<24x288xf32>
    %59 = arith.addf %56, %58 : vector<24x288xf32>
    %c0_68 = arith.constant 0 : index
    %c0_69 = arith.constant 0 : index
    %60 = vector.load %arg7[%c0_68, %c0_69] : memref<16x24xf32, #tpu.memory_space<vmem>>, vector<16x24xf32>
    %cst_70 = arith.constant dense<0.000000e+00> : vector<16x288xf32>
    %61 = tpu.matmul %60, %59, %cst_70 {dimension_numbers = #tpu.dot_dimension_numbers<[1], [0], [0], [1], [0, 0, 1, 1], [], []>} : vector<16x24xf32>, vector<24x288xf32>, vector<16x288xf32> -> vector<16x288xf32>
    %c0_71 = arith.constant 0 : index
    %c0_72 = arith.constant 0 : index
    %62 = vector.load %arg8[%c0_71, %c0_72] : memref<16x1xf32, #tpu.memory_space<vmem>>, vector<16x1xf32>
    %63 = vector.broadcast %62 : vector<16x1xf32> to vector<16x288xf32>
    %64 = arith.addf %61, %63 : vector<16x288xf32>
    %cst_73 = arith.constant 0.000000e+00 : f32
    %cst_74 = arith.constant 6.000000e+00 : f32
    %65 = vector.broadcast %cst_73 : f32 to vector<16x288xf32>
    %66 = arith.maximumf %65, %64 : vector<16x288xf32>
    %67 = vector.broadcast %cst_74 : f32 to vector<16x288xf32>
    %68 = arith.minimumf %67, %66 : vector<16x288xf32>
    %69 = vector.extract_strided_slice %1 {offsets = [0, 19], sizes = [16, 288], strides = [1, 1]} : vector<16x384xf32> to vector<16x288xf32>
    %70 = arith.addf %68, %69 : vector<16x288xf32>
    %c0_75 = arith.constant 0 : index
    %c0_76 = arith.constant 0 : index
    %c0_77 = arith.constant 0 : index
    %71 = vector.load %arg9[%c0_75, %c0_76, %c0_77] : memref<1x16x288xf32, #tpu.memory_space<vmem>>, vector<1x16x288xf32>
    %72 = vector.shape_cast %71 : vector<1x16x288xf32> to vector<16x288xf32>
    %73 = vector.shape_cast %70 : vector<16x288xf32> to vector<1x16x288xf32>
    tpu.vector_store %arg9[%c0_75, %c0_76, %c0_77], %73 {strides = array<i32>} : memref<1x16x288xf32, #tpu.memory_space<vmem>>, vector<1x16x288xf32>,
    return
  }
  func.func @transform_0(%arg0: i32) -> (i32, i32, i32) {
    %c0_i32 = arith.constant 0 : i32
    %c0_i32_0 = arith.constant 0 : i32
    %c0_i32_1 = arith.constant 0 : i32
    return %arg0, %c0_i32, %c0_i32_0 : i32, i32, i32
  }
  func.func @transform_1(%arg0: i32) -> (i32, i32) {
    %c0_i32 = arith.constant 0 : i32
    %c0_i32_0 = arith.constant 0 : i32
    %c0_i32_1 = arith.constant 0 : i32
    return %c0_i32, %c0_i32_0 : i32, i32
  }
  func.func @transform_2(%arg0: i32) -> (i32, i32) {
    %c0_i32 = arith.constant 0 : i32
    %c0_i32_0 = arith.constant 0 : i32
    %c0_i32_1 = arith.constant 0 : i32
    return %c0_i32, %c0_i32_0 : i32, i32
  }
  func.func @transform_3(%arg0: i32) -> (i32, i32) {
    %c0_i32 = arith.constant 0 : i32
    %c0_i32_0 = arith.constant 0 : i32
    %c0_i32_1 = arith.constant 0 : i32
    return %c0_i32, %c0_i32_0 : i32, i32
  }
  func.func @transform_4(%arg0: i32) -> (i32, i32, i32, i32) {
    %c0_i32 = arith.constant 0 : i32
    %c0_i32_0 = arith.constant 0 : i32
    %c0_i32_1 = arith.constant 0 : i32
    %c0_i32_2 = arith.constant 0 : i32
    %c0_i32_3 = arith.constant 0 : i32
    return %c0_i32, %c0_i32_0, %c0_i32_1, %c0_i32_2 : i32, i32, i32, i32
  }
  func.func @transform_5(%arg0: i32) -> (i32, i32) {
    %c0_i32 = arith.constant 0 : i32
    %c0_i32_0 = arith.constant 0 : i32
    %c0_i32_1 = arith.constant 0 : i32
    return %c0_i32, %c0_i32_0 : i32, i32
  }
  func.func @transform_6(%arg0: i32) -> (i32, i32) {
    %c0_i32 = arith.constant 0 : i32
    %c0_i32_0 = arith.constant 0 : i32
    %c0_i32_1 = arith.constant 0 : i32
    return %c0_i32, %c0_i32_0 : i32, i32
  }
  func.func @transform_7(%arg0: i32) -> (i32, i32) {
    %c0_i32 = arith.constant 0 : i32
    %c0_i32_0 = arith.constant 0 : i32
    %c0_i32_1 = arith.constant 0 : i32
    return %c0_i32, %c0_i32_0 : i32, i32
  }
  func.func @transform_8(%arg0: i32) -> (i32, i32, i32) {
    %c0_i32 = arith.constant 0 : i32
    %c0_i32_0 = arith.constant 0 : i32
    %c0_i32_1 = arith.constant 0 : i32
    return %arg0, %c0_i32, %c0_i32_0 : i32, i32, i32
  }
}

</mosaic_0001>

<bundles_post_ra>
// kernel: tpu_custom_call.1
= control target key start
LH: loop header
LB: loop body
LE: loop exit
PB: predicated region body
PF: predicated region fallthrough
CT: control target
= control target key end

     0   :  { %13 = vsyncpa [#allocation4], 0  ;;  %s4233_s0 = inlined_call_operand.vmem [shape: f32[2,16,384], index: 0, kind: input, shape index: {}]   ;;  %s4234_s1 = inlined_call_operand.hbm [shape: f32[1,384], index: 1, kind: input, shape index: {}]   ;;  %s4235_s2 = inlined_call_operand.vmem [shape: f32[24,16], index: 2, kind: input, shape index: {}]   ;;  %s4236_s3 = inlined_call_operand.vmem [shape: f32[24,1], index: 3, kind: input, shape index: {}]   ;;  %s4237_s4 = inlined_call_operand.hbm [shape: f32[3,3,24,24], index: 4, kind: input, shape index: {}]   ;;  %s4238_s5 = inlined_call_operand.vmem [shape: f32[24,1], index: 5, kind: input, shape index: {}]   ;;  %s4239_s6 = inlined_call_operand.vmem [shape: f32[16,24], index: 6, kind: input, shape index: {}]   ;;  %s4240_s7 = inlined_call_operand.vmem [shape: f32[16,1], index: 7, kind: input, shape index: {}]   ;;  %s4241_s8 = inlined_call_operand.hbm [shape: f32[2,16,288], index: 8, kind: output, shape index: {}]  }
   0x1   :  { %14 = vsyncpa [#allocation7], 0 }
   0x2   :  { %15 = vsyncpa [#allocation5], 0 }
   0x3   :  { %17 = vsyncpa [#allocation5 + $0x1], 0  ;;  %s3670_s27 = smov 0   ;;  %s3672_s28 = smov 0  }
   0x4   :  { %s3674_s29 = smov 0   ;;  %s3676_s30 = smov 0  }
   0x5 LB: > { %s3691_s9 = sadd.s32 4294967295, %s3604_s30   ;;  %s2854_s10 = sadd.s32 4294967294, %s3604_s30   ;;  %s3604_s30 = sphi %s3676_s30, %s4259_s30   ;;  %s3600_s29 = sphi %s3674_s29, %s4258_s29   ;;  %s3596_s28 = sphi %s3672_s28, %s4257_s28   ;;  %s3592_s27 = sphi %s3670_s27, %s4256_s27  }
   0x6   : > { %s3695_s11 = sadd.s32 1, %s3604_s30   ;;  %s203_s12 = sadd.s32 1, %s3600_s29 }
   0x7   : > { %s200_s13 = ssub.s32 %s3604_s30, %s3695_s11  ;;  %p213_p0 = scmp.ne.s32.totalorder %s3600_s29, %s3596_s28 }
   0x8   : > { %p201_p1 = scmp.eq.s32.totalorder %s200_s13, 0  ;;  %p214_p2 = scmp.eq.s32.totalorder %s3691_s9, 1 }
   0x9   : > { %p219_p3 = scmp.ne.s32.totalorder %s3596_s28, %s3592_s27  ;;  %p220_p4 = scmp.eq.s32.totalorder %s2854_s10, 1 }
   0xa   : > { %s3706_s14 = scalar_select %p201_p1, %s3600_s29, %s203_s12  }
   0xb   : > { %p3708_p5 = por %p214_p2, %p213_p0  ;;  %p3712_p6 = por %p220_p4, %p219_p3 }
   0xc   : > { %p2855_p7 = scmp.ge.s32.totalorder %s3604_s30, 1  ;;  %p227_p8 = scmp.lt.s32.totalorder %s3604_s30, 3 }
   0xd   : > { %s4245_s15 = scalar_select %p3708_p5, 1, 0 }
   0xe   : > { %s4246_s16 = scalar_select %p3712_p6, 1, 0 }
   0xf   : > { %p4242_p9 = scmp.eq.s32.totalorder %s3691_s9, 0  ;;  %p3719_p10 = pnand %p2855_p7, %p227_p8 }
  0x10   : > { %s3606_s18 = smov [#allocation3]   ;;  %s3607_s20 = smov [#allocation6]  }
  0x11   : > { %s4247_s17 = scalar_select %p3719_p10, 1, 0 }
  0x12   : > { %s240_s19 = sshll.u32 %s3606_s18, 4  ;;  %p3290_p11 = pneg %p3719_p10  ;;  %s241_s19 = int_to_ptr.vmem [resolvable:$true] %s240_s19 }
  0x13   : > { %s256_s21 = sshll.u32 %s3607_s20, 4  ;;  %s3478_s25 = scalar_lea.hbm %s4234_s1, 48  ;;  %s3731_s21 = int_to_ptr.vmem [resolvable:$true] %s256_s21 }
  0x14   : > { %p3727_p12 = pnand %p4242_p9, %p3290_p11  ;;  %p3479_p13 = scmp.ne.s32.totalorder %s4234_s1, %s3478_s25 }
  0x15   : > { %p3485_p3 = scmp.lt.u32.totalorder %s3478_s25, %s4234_s1 }
  0x16   : > { %p3480_p0 = pneg %p3727_p12 }
  0x18   : > { %p3481_p1 = pnand %p3480_p0, %p3479_p13 }
  0x1a   : > { %p3482_p2 = pneg %p3481_p1 }
  0x1c   : > { %p3487_p4 = pnand %p3485_p3, %p3482_p2 }
  0x1e   : > { %3490 = shalt.err (!%p3487_p4)
}
  0x1f   : > { %s3491_s18 = scalar_lea.vmem %s241_s19, 48  ;;  %s3498_s20 = scalar_lea.vmem %s241_s19, 64 }
  0x20   : > { %p3492_p7 = scmp.ne.s32.totalorder %s241_s19, %s3491_s18  ;;  %p3499_p9 = scmp.lt.s32.totalorder %s241_s19, %s241_s19 }
  0x21   : > { %p3500_p6 = scmp.lt.s32.totalorder %s3498_s20, %s3491_s18 }
  0x22   : > { %p3494_p8 = pnand %p3492_p7, %p3480_p0 }
  0x23   : > { %p3501_p5 = por %p3500_p6, %p3499_p9 }
  0x24   : > { %p3495_p11 = pneg %p3494_p8 }
  0x26   : > { %p3502_p10 = pnand %p3501_p5, %p3495_p11 }
  0x28   : > { %3505 = shalt.err (!%p3502_p10)
}
  0x29   : > { %3293 = dma.hbm_to_vmem [thread:$0]  (!%p3727_p12), %s4234_s1, 48, %s241_s19, [#allocation4]  }
  0x2a   : > { %s3506_s10 = scalar_lea.hbm %s4237_s4, 3456 }
  0x2b   : > { %p3507_p13 = scmp.ne.s32.totalorder %s4237_s4, %s3506_s10  ;;  %p3513_p9 = scmp.lt.u32.totalorder %s3506_s10, %s4237_s4 }
  0x2d   : > { %p3509_p6 = pnand %p3507_p13, %p3480_p0 }
  0x2f   : > { %p3510_p5 = pneg %p3509_p6 }
  0x31   : > { %p3515_p10 = pnand %p3513_p9, %p3510_p5 }
  0x33   : > { %3518 = shalt.err (!%p3515_p10)
}
  0x34   : > { %s3519_s19 = scalar_lea.vmem %s3731_s21, 3456  ;;  %p3527_p4 = scmp.lt.s32.totalorder %s3731_s21, %s3731_s21 }
  0x35   : > { %p3520_p1 = scmp.ne.s32.totalorder %s3731_s21, %s3519_s19  ;;  %p3528_p7 = scmp.lt.s32.totalorder %s3519_s19, %s3519_s19 }
  0x37   : > { %p3522_p2 = pnand %p3520_p1, %p3480_p0  ;;  %p3529_p8 = por %p3528_p7, %p3527_p4 }
  0x39   : > { %p3523_p3 = pneg %p3522_p2 }
  0x3b   : > { %p3530_p11 = pnand %p3529_p8, %p3523_p3 }
  0x3d   : > { %3533 = shalt.err (!%p3530_p11)
}
  0x3e   : > { %s3608_s23 = smov 128   ;;  %s3609_s24 = smov 8  }
  0x3f   : > { %3296 = dma.hbm_to_vmem [thread:$0]  (!%p3727_p12), %s4237_s4, 3456, %s3731_s21, [#allocation7], %s3608_s23, %s3608_s23, %s3609_s24  }
  0x40   : > { %p4249_p13 = scmp.ne.s32.totalorder %s4247_s17, 0 }
  0x41   : > { %p4250_p0 = scmp.eq.s32.totalorder (!%p4249_p13), %s3691_s9, 0 }
  0x42   : > { %289 = sbr.rel (%p4249_p13) target bundleno = 1001 (0x3e9), region = 52 }
  0x49   : > { %3579 = dma.done.wait (%p4250_p0), [#allocation4], 48   ;;  %p4251_p6 = pmov %p4250_p0 }
  0x4a   : > { %p4252_p5 = pmov %p4250_p0 }
  0x4b   : > { %3581 = vsyncadd (%p4251_p6), [#allocation4], 4294967248 }
  0x4c   : > { %3583 = dma.done.wait (%p4252_p5), [#allocation7], 3456   ;;  %p4253_p9 = pmov %p4250_p0 }
  0x4d   : > { %p327_p10 = scmp.lt.s32.totalorder %s3691_s9, 1  ;;  %v3610_v0 = vmov 0.0|0.0   ;;  %vm3611_vm0 = vmmov 0   ;;  %v3612_v1 = vmov 0.0   ;;  %v3613_v2 = vmov 0   ;;  %v341_v12 = vld [vmem:[%s4236_s3] sm:$0xff] }
  0x4e   : > { %3585 = vsyncadd (%p4253_p9), [#allocation7], 4294963840  ;;  %3155 = vmatprep.subr.bf16.mxu1 %v3610_v0  ;;  %2998 = vmatprep.mubr.msk.f32.mxu1 %vm3611_vm0, %v3612_v1  ;;  %v343_v13 = vld [vmem:[%s4236_s3 + $0x10] sm:$0xff]  ;;  %v338_v14 = vld [vmem:[%s4235_s2] sm:$0xff]  ;;  %vm385_vm1 = vcmask 130048   ;;  %v361_v18 = vlaneseq  ;;  %s3615_s13 = smov 126  }
  0x4f   : > { %s328_s17 = scalar_select %p327_p10, %s3691_s9, 1  ;;  %459 = vmatprep.mubr.f32.mxu0 %v3612_v1  ;;  %3356 = vset.pattern.permute.xlu0 %v3613_v2  ;;  %v342_v15 = vld [vmem:[%s4236_s3 + $0x8] sm:$0xff]  ;;  %v340_v17 = vld [vmem:[%s4235_s2 + $0x10] sm:$0xff]  ;;  %v344_v21 = vld [vmem:[#allocation3] sm:$0x7]  ;;  %vm610_vm2 = vcmask 1039360  }
  0x50   : > { %3357 = vset.pattern.permute.xlu1 %v3613_v2  ;;  %347 = vperm.xlu0 %3356, %v341_v12   ;;  %v339_v16 = vld [vmem:[%s4235_s2 + $0x8] sm:$0xff]  ;;  %v362_v19 = vshrl.u32 %v361_v18, 7  ;;  %s3616_s18 = smov 110   ;;  %s3617_s20 = smov 109   ;;  %v2506_v12 = vld [vmem:[%s4238_s5 + $0x10] sm:$0xff]  ;;  %vm626_vm3 = vcmask 195584  }
  0x51   : > { %s3278_s21 = smul.u32 48, %s328_s17  ;;  %357 = vperm.xlu1 %3357, %v343_v13   ;;  %s3618_s19 = smov 108   ;;  %v2533_v13 = vld [vmem:[%s4240_s7] sm:$0xff]  ;;  %vm993_vm4 = vcmask 1031168   ;;  %vm1212_vm5 = vcmask 900096   ;;  %vm1431_vm6 = vcmask 891904  }
  0x52   : > { %v371_v20 = vsub.s32 2, %v362_v19  ;;  %v367_v22 = vsub.s32 1, %v362_v19  ;;  %v363_v24 = vsub.s32 0, %v362_v19  ;;  %s3619_s23 = smov 92   ;;  %s3620_s24 = smov 91   ;;  %vm1650_vm7 = vcmask 883712  }
  0x53   : > { %s331_s12 = scalar_lea.vmem %s4233_s0, %s3278_s21  ;;  %s3621_s25 = smov 90   ;;  %vm1869_vm8 = vcmask 752640   ;;  %vm2088_vm9 = vcmask 744448   ;;  %vm2307_vm10 = vcmask 736256   ;;  %vm2751_vm11 = vcmask 261120  }
  0x54   : > { %v3799_v3 = vld [vmem:[%s331_s12 + $0x8] sm:$0xff]  ;;  %v3801_v4 = vld [vmem:[%s331_s12 + $0x20] sm:$0xff]  ;;  %v3803_v5 = vld [vmem:[%s331_s12 + $0x10] sm:$0xff]  ;;  %352 = vperm.xlu0 %3356, %v342_v15   ;;  %v372_v25 = vrot.slane %v344_v21, %v371_v20  ;;  %v368_v26 = vrot.slane %v344_v21, %v367_v22  ;;  %v364_v27 = vrot.slane %v344_v21, %v363_v24  ;;  %s324_s17 = sand.u32 1, %s3596_s28   ;;  %p4254_p1 = scmp.ne.s32.totalorder %s4245_s15, 0 }
  0x55   : > { %v3151_v6 = vpack.c.bf16 %v3801_v4, %v3799_v3  ;;  %v3807_v7 = vld [vmem:[%s331_s12 + $0x28] sm:$0xff]  ;;  %v3809_v8 = vld [vmem:[%s331_s12] sm:$0xff]  ;;  %v3811_v9 = vld [vmem:[%s331_s12 + $0x18] sm:$0xff]  ;;  %s3614_s12 = smov 127   ;;  %s3277_s21 = smul.u32 48, %s324_s17 }
  0x56   : > { %v3156_v10 = vpack.c.bf16 %v3807_v7, %v3803_v5  ;;  %v3153_v11 = vpack.c.bf16 %v3811_v9, %v3809_v8 }
  0x57   : > { %3152 = vmatprep.subr.bf16.mxu0 %v3151_v6  ;;  %s326_s22 = scalar_lea.vmem [#allocation8], %s3277_s21 }
  0x58   : > { %3157 = vmatpush3.bf16.msra.mxu1 %v3156_v10  ;;  %3154 = vmatpush1.bf16.msra.mxu0 %v3153_v11  ;;  %v2504_v10 = vld [vmem:[%s4238_s5] sm:$0xff]  ;;  %v2505_v11 = vld [vmem:[%s4238_s5 + $0x8] sm:$0xff]  ;;  %s2770_s10 = sshll.u32 %s326_s22, 4  ;;  %s4183_s10 = int_to_ptr.vmem [resolvable:$true] %s2770_s10 }
  0x59   : > { %3162 = vmatprep.subr.bf16.mxu1 %v3610_v0 }
  0x5b   : > { %2999 = vmatmul.mubr.msk.f32.vlgmr.msra.gmra.mrb[0].mxu1 %vm385_vm1, %v338_v14  ;;  %2863 = vmatmul.mubr.msk.f32.vlgmr.msra.gmra.mrb[0].mxu0 %vm385_vm1, %v338_v14  ;;  %v2534_v14 = vld [vmem:[%s4240_s7 + $0x8] sm:$0xff] }
  0x5c   : > { %3001 = vmatprep.mubr.msk.f32.mxu1 %vm3611_vm0, %v3612_v1  ;;  %465 = vmatprep.mubr.f32.mxu0 %v3612_v1 }
  0x5f   : > { %3002 = vmatmul.mubr.msk.f32.gmra.mrb[2].mxu1 %vm385_vm1, %v339_v16  ;;  %2864 = vmatmul.mubr.msk.f32.gmra.mrb[2].mxu0 %vm385_vm1, %v339_v16 }
  0x60   : > { %471 = vmatprep.mubr.f32.mxu0 %v3612_v1  ;;  %3004 = vmatprep.mubr.msk.f32.mxu1 %vm3611_vm0, %v3612_v1 }
  0x63   : > { %2865 = vmatmul.mubr.msk.f32.gmra.mrb[4].mxu0 %vm385_vm1, %v340_v17  ;;  %3005 = vmatmul.mubr.msk.f32.gmra.mrb[4].mxu1 %vm385_vm1, %v340_v17 }
  0x64   : > { %3013 = vmatprep.mubr.msk.f32.mxu1 %vm3611_vm0, %v3612_v1  ;;  %700 = vmatprep.mubr.f32.mxu0 %v3612_v1 }
  0xcf   : > { %v348_v23 = vpop.permute.xlu0 %347 }
  0xd0   : > { %v378_v28 = vmul.f32 %v372_v25, %v348_v23  ;;  %v377_v29 = vmul.f32 %v368_v26, %v348_v23  ;;  %v358_v31 = vpop.permute.xlu1 %357  ;;  %v376_v34 = vmul.f32 %v364_v27, %v348_v23 }
  0xd1   : > { %v383_v39 = vmul.f32 %v368_v26, %v358_v31  ;;  %v384_v43 = vmul.f32 %v372_v25, %v358_v31  ;;  %v382_v61 = vmul.f32 %v364_v27, %v358_v31 }
  0xd3   : > { %v353_v30 = vpop.permute.xlu0 %352 }
  0xd4   : > { %v381_v40 = vmul.f32 %v372_v25, %v353_v30  ;;  %v379_v41 = vmul.f32 %v364_v27, %v353_v30  ;;  %v380_v42 = vmul.f32 %v368_v26, %v353_v30 }
 0x12e   : > { %v461_v32 = vpop.f32.mrb[0].mxu0  ;;  %v544_v33 = vpop.f32.mrb[0].mxu1 }
 0x12f   : > { %v3851_v35 = vadd.f32 %v544_v33, %v378_v28  ;;  %v463_v36 = vpop.f32.mrb[1].mxu0  ;;  %v3000_v37 = vpop.f32.mrb[1].mxu1  ;;  %v3859_v47 = vadd.f32 %v461_v32, %v376_v34  ;;  %v580_v28 = vld [vmem:[#allocation6 + $0x18] sm:$0xff]  ;;  %v581_v32 = vld [vmem:[#allocation6 + $0x20] sm:$0xff] }
 0x130   : > { %v3853_v38 = vadd.f32 %v463_v36, %v377_v29 }
 0x132   : > { %v549_v44 = vpop.f32.mrb[2].mxu1  ;;  %v467_v45 = vpop.f32.mrb[2].mxu0  ;;  %v3857_v46 = vpack.i.bf16 %v3851_v35, %v3853_v38 }
 0x133   : > { %v3861_v48 = vadd.f32 %v467_v45, %v379_v41  ;;  %v469_v49 = vpop.f32.mrb[3].mxu0  ;;  %v3003_v50 = vpop.f32.mrb[3].mxu1  ;;  %v3863_v51 = vadd.f32 %v549_v44, %v381_v40 }
 0x134   : > { %v3865_v52 = vadd.f32 %v469_v49, %v380_v42  ;;  %3359 = vrot.lane.b32.xlu1 %v3857_v46, %s3614_s12 }
 0x135   : > { %v3363_v53 = vpack.i.bf16 %v3861_v48, %v3859_v47  ;;  %v3170_v62 = vpack.c.bf16 %v3863_v51, %v3851_v35  ;;  %v3167_v2 = vpack.c.bf16 %v3861_v48, %v3859_v47  ;;  %v582_v35 = vld [vmem:[#allocation6 + $0x28] sm:$0xff]  ;;  %v576_v47 = vld [vmem:[#allocation6] sm:$0xff] }
 0x136   : > { %v473_v54 = vpop.f32.mrb[4].mxu0  ;;  %v3368_v55 = vpack.i.bf16 %v3863_v51, %v3865_v52  ;;  %v554_v56 = vpop.f32.mrb[4].mxu1  ;;  %v3165_v63 = vpack.c.bf16 %v3865_v52, %v3853_v38 }
 0x137   : > { %v475_v57 = vpop.f32.mrb[5].mxu0  ;;  %v3872_v58 = vadd.f32 %v554_v56, %v384_v43  ;;  %v3006_v59 = vpop.f32.mrb[5].mxu1  ;;  %v3884_v6 = vadd.f32 %v473_v54, %v382_v61  ;;  %v577_v54 = vld [vmem:[#allocation6 + $0x8] sm:$0xff] }
 0x138   : > { %3369 = vrot.lane.b32.xlu0 %v3368_v55, %s3614_s12  ;;  %3364 = vrot.lane.b32.xlu1 %v3363_v53, %s3614_s12  ;;  %v3874_v60 = vadd.f32 %v475_v57, %v383_v39 }
 0x13c   : > { %606 = vrot.lane.b32.xlu0 %v3874_v60, %s3614_s12  ;;  %608 = vrot.lane.b32.xlu1 %v3872_v58, %s3614_s12 }
 0x140   : > { %604 = vrot.lane.b32.xlu0 %v3884_v6, %s3614_s12  ;;  %3374 = vrot.lane.b32.xlu1 %v3857_v46, %s3615_s13  ;;  %s3279_s12 = smul.u32 768, %s3691_s9 }
 0x144   : > { %3379 = vrot.lane.b32.xlu0 %v3368_v55, %s3615_s13  ;;  %3384 = vrot.lane.b32.xlu1 %v3363_v53, %s3615_s13 }
 0x148   : > { %989 = vrot.lane.b32.xlu0 %v3874_v60, %s3615_s13  ;;  %991 = vrot.lane.b32.xlu1 %v3872_v58, %s3615_s13 }
 0x14c   : > { %987 = vrot.lane.b32.xlu0 %v3884_v6, %s3615_s13  ;;  %3389 = vrot.lane.b32.xlu1 %v3857_v46, %s3616_s18 }
 0x150   : > { %3394 = vrot.lane.b32.xlu0 %v3368_v55, %s3616_s18  ;;  %3399 = vrot.lane.b32.xlu1 %v3363_v53, %s3616_s18 }
 0x154   : > { %1208 = vrot.lane.b32.xlu0 %v3874_v60, %s3616_s18  ;;  %1210 = vrot.lane.b32.xlu1 %v3872_v58, %s3616_s18 }
 0x158   : > { %1206 = vrot.lane.b32.xlu0 %v3884_v6, %s3616_s18  ;;  %3404 = vrot.lane.b32.xlu1 %v3857_v46, %s3617_s20  ;;  %s4188_s18 = scalar_lea.hbm %s4241_s8, %s3279_s12 }
 0x15c   : > { %3409 = vrot.lane.b32.xlu0 %v3368_v55, %s3617_s20  ;;  %3414 = vrot.lane.b32.xlu1 %v3363_v53, %s3617_s20 }
 0x160   : > { %1427 = vrot.lane.b32.xlu0 %v3874_v60, %s3617_s20  ;;  %1429 = vrot.lane.b32.xlu1 %v3872_v58, %s3617_s20 }
 0x164   : > { %1425 = vrot.lane.b32.xlu0 %v3884_v6, %s3617_s20  ;;  %3419 = vrot.lane.b32.xlu1 %v3857_v46, %s3618_s19 }
 0x168   : > { %3424 = vrot.lane.b32.xlu0 %v3368_v55, %s3618_s19  ;;  %3429 = vrot.lane.b32.xlu1 %v3363_v53, %s3618_s19 }
 0x16c   : > { %1646 = vrot.lane.b32.xlu0 %v3874_v60, %s3618_s19  ;;  %1648 = vrot.lane.b32.xlu1 %v3872_v58, %s3618_s19 }
 0x170   : > { %1644 = vrot.lane.b32.xlu0 %v3884_v6, %s3618_s19  ;;  %3434 = vrot.lane.b32.xlu1 %v3857_v46, %s3619_s23  ;;  %s4192_s19 = scalar_lea.sflag [#allocation5], %s324_s17 }
 0x174   : > { %3439 = vrot.lane.b32.xlu0 %v3368_v55, %s3619_s23  ;;  %3444 = vrot.lane.b32.xlu1 %v3363_v53, %s3619_s23 }
 0x178   : > { %1865 = vrot.lane.b32.xlu0 %v3874_v60, %s3619_s23  ;;  %1867 = vrot.lane.b32.xlu1 %v3872_v58, %s3619_s23 }
 0x17c   : > { %1863 = vrot.lane.b32.xlu0 %v3884_v6, %s3619_s23  ;;  %3449 = vrot.lane.b32.xlu1 %v3857_v46, %s3620_s24  ;;  %s3534_s23 = scalar_lea.vmem %s4183_s10, 768 }
 0x17d   : > { %p3535_p12 = scmp.ne.s32.totalorder %s4183_s10, %s3534_s23 }
 0x17f   : > { %p3536_p2 = pnand %p3535_p12, %p4254_p1 }
 0x180   : > { %3454 = vrot.lane.b32.xlu0 %v3368_v55, %s3620_s24  ;;  %3459 = vrot.lane.b32.xlu1 %v3363_v53, %s3620_s24 }
 0x181   : > { %p3537_p3 = pneg %p3536_p2 }
 0x184   : > { %2084 = vrot.lane.b32.xlu0 %v3874_v60, %s3620_s24  ;;  %2086 = vrot.lane.b32.xlu1 %v3872_v58, %s3620_s24 }
 0x188   : > { %2082 = vrot.lane.b32.xlu0 %v3884_v6, %s3620_s24  ;;  %3464 = vrot.lane.b32.xlu1 %v3857_v46, %s3621_s25 }
 0x18c   : > { %3469 = vrot.lane.b32.xlu0 %v3368_v55, %s3621_s25  ;;  %3474 = vrot.lane.b32.xlu1 %v3363_v53, %s3621_s25 }
 0x190   : > { %2303 = vrot.lane.b32.xlu0 %v3874_v60, %s3621_s25  ;;  %2305 = vrot.lane.b32.xlu1 %v3872_v58, %s3621_s25 }
 0x194   : > { %2301 = vrot.lane.b32.xlu0 %v3884_v6, %s3621_s25  ;;  %2509 = vperm.xlu1 %3357, %v2504_v10  }
 0x198   : > { %2514 = vperm.xlu0 %3356, %v2505_v11   ;;  %2519 = vperm.xlu1 %3357, %v2506_v12  }
 0x19c   : > { %2537 = vperm.xlu0 %3356, %v2533_v13   ;;  %2542 = vperm.xlu1 %3357, %v2534_v14  }
 0x1a0   : > { %2723 = vrot.lane.b32.xlu1 %v3799_v3, %s3617_s20  ;;  %2721 = vrot.lane.b32.xlu0 %v3809_v8, %s3617_s20 }
 0x1a4   : > { %2727 = vrot.lane.b32.xlu1 %v3811_v9, %s3617_s20  ;;  %2725 = vrot.lane.b32.xlu0 %v3803_v5, %s3617_s20 }
 0x1a6   : > { %v3360_v15 = vpop.permute.xlu1 %3359 }
 0x1a7   : > { %v3362_v16 = vunpack.i.h.bf16 %v3360_v15  ;;  %v3361_v17 = vunpack.i.l.bf16 %v3360_v15  ;;  %v972_v15 = vld [vmem:[#allocation6 + $0x30] sm:$0xff] }
 0x1a8   : > { %2731 = vrot.lane.b32.xlu1 %v3807_v7, %s3617_s20  ;;  %2729 = vrot.lane.b32.xlu0 %v3801_v4, %s3617_s20  ;;  %s3622_s20 = smov [#allocation8]  }
 0x1a9   : > { %v612_v9 = vsel %vm610_vm2, %v3361_v17, %v3362_v16  ;;  %s3538_s24 = sshll.u32 %s3622_s20, 4  ;;  %s3539_s24 = int_to_ptr.vmem [resolvable:$false] %s3538_s24 }
 0x1aa   : > { %v3370_v3 = vpop.permute.xlu0 %3369  ;;  %v3365_v18 = vpop.permute.xlu1 %3364  ;;  %s3540_s25 = scalar_lea.vmem %s3539_s24, 1536  ;;  %p3541_p4 = scmp.lt.s32.totalorder %s4183_s10, %s3539_s24 }
 0x1ab   : > { %v3372_v19 = vunpack.i.h.bf16 %v3370_v3  ;;  %v3371_v8 = vunpack.i.l.bf16 %v3370_v3  ;;  %v3367_v20 = vunpack.i.h.bf16 %v3365_v18  ;;  %v3366_v21 = vunpack.i.l.bf16 %v3365_v18  ;;  %p3542_p7 = scmp.lt.s32.totalorder %s3540_s25, %s3534_s23 }
 0x1ad   : > { %v3163_v22 = vpack.c.bf16 %v3372_v19, %v3362_v16  ;;  %v613_v5 = vsel %vm610_vm2, %v3367_v20, %v3371_v8  ;;  %v611_v23 = vsel %vm610_vm2, %v3366_v21, %v3361_v17  ;;  %v614_v24 = vsel %vm610_vm2, %v3371_v8, %v3372_v19  ;;  %v973_v20 = vld [vmem:[#allocation6 + $0x38] sm:$0xff]  ;;  %p3543_p8 = por %p3542_p7, %p3541_p4 }
 0x1ae   : > { %v3160_v7 = vpack.c.bf16 %v613_v5, %v611_v23  ;;  %v607_v25 = vpop.permute.xlu0 %606  ;;  %v609_v26 = vpop.permute.xlu1 %608  ;;  %v3158_v4 = vpack.c.bf16 %v614_v24, %v612_v9 }
 0x1af   : > { %3164 = vmatpush3.bf16.msra.mxu1 %v3163_v22  ;;  %v616_v27 = vsel %vm610_vm2, %v607_v25, %v609_v26  ;;  %p3544_p11 = pnand %p3543_p8, %p3537_p3 }
 0x1b0   : > { %3159 = vmatprep.subr.bf16.mxu0 %v3158_v4  ;;  %3011 = vmatprep.subr.mxu1 %v3612_v1 }
 0x1b1   : > { %3161 = vmatpush1.bf16.msra.mxu0 %v3160_v7 }
 0x1b2   : > { %v605_v29 = vpop.permute.xlu0 %604  ;;  %v3375_v30 = vpop.permute.xlu1 %3374  ;;  %640 = vmatprep.subr.mxu0 %v616_v27 }
 0x1b3   : > { %v615_v31 = vsel %vm610_vm2, %v605_v29, %v607_v25  ;;  %3012 = vmatpush3.msra.mxu1 %v609_v26  ;;  %v3377_v33 = vunpack.i.h.bf16 %v3375_v30  ;;  %v3376_v34 = vunpack.i.l.bf16 %v3375_v30  ;;  %v974_v26 = vld [vmem:[#allocation6 + $0x40] sm:$0xff] }
 0x1b4   : > { %3014 = vmatmul.mubr.msk.f32.vlgmr.msra.gmra.mrb[6].mxu1 %vm626_vm3, %v580_v28  ;;  %3169 = vmatprep.subr.bf16.mxu1 %v3610_v0 }
 0x1b5   : > { %641 = vmatpush1.msra.mxu0 %v615_v31  ;;  %3171 = vmatpush3.bf16.msra.mxu1 %v3170_v62  ;;  %v995_v44 = vsel %vm993_vm4, %v3376_v34, %v3377_v33 }
 0x1b6   : > { %v3380_v36 = vpop.permute.xlu0 %3379  ;;  %v3385_v37 = vpop.permute.xlu1 %3384  ;;  %2869 = vmatmul.mubr.msk.f32.vlgmr.msra.gmra.mrb[6].mxu0 %vm626_vm3, %v580_v28  ;;  %3166 = vmatprep.subr.bf16.mxu0 %v3165_v63  ;;  %v578_v63 = vld [vmem:[#allocation6 + $0x10] sm:$0xff] }
 0x1b7   : > { %v3382_v39 = vunpack.i.h.bf16 %v3380_v36  ;;  %v3381_v40 = vunpack.i.l.bf16 %v3380_v36  ;;  %3016 = vmatprep.mubr.msk.f32.mxu1 %vm3611_vm0, %v3612_v1  ;;  %3168 = vmatpush1.bf16.msra.mxu0 %v3167_v2  ;;  %v3387_v38 = vunpack.i.h.bf16 %v3385_v37  ;;  %v3386_v41 = vunpack.i.l.bf16 %v3385_v37 }
 0x1b8   : > { %3017 = vmatmul.mubr.msk.f32.gmra.mrb[8].mxu1 %vm626_vm3, %v581_v32  ;;  %812 = vmatprep.subr.mxu0 %v3874_v60 }
 0x1b9   : > { %3026 = vmatprep.subr.mxu1 %v3612_v1  ;;  %706 = vmatprep.mubr.f32.mxu0 %v3612_v1  ;;  %v997_v45 = vsel %vm993_vm4, %v3381_v40, %v3382_v39  ;;  %v996_v48 = vsel %vm993_vm4, %v3387_v38, %v3381_v40  ;;  %v994_v49 = vsel %vm993_vm4, %v3386_v41, %v3376_v34  ;;  %v1192_v38 = vld [vmem:[#allocation6 + $0x50] sm:$0xff] }
 0x1ba   : > { %3027 = vmatpush3.msra.mxu1 %v3872_v58  ;;  %v990_v42 = vpop.permute.xlu0 %989  ;;  %v992_v43 = vpop.permute.xlu1 %991  ;;  %2870 = vmatmul.mubr.msk.f32.gmra.mrb[8].mxu0 %vm626_vm3, %v581_v32  ;;  %v3172_v46 = vpack.c.bf16 %v997_v45, %v995_v44  ;;  %v3177_v52 = vpack.c.bf16 %v3382_v39, %v3377_v33  ;;  %v3174_v53 = vpack.c.bf16 %v996_v48, %v994_v49  ;;  %v1191_v33 = vld [vmem:[#allocation6 + $0x48] sm:$0xff]  ;;  %v1193_v49 = vld [vmem:[#allocation6 + $0x58] sm:$0xff] }
 0x1bb   : > { %3019 = vmatprep.mubr.msk.f32.mxu1 %vm3611_vm0, %v3612_v1  ;;  %813 = vmatpush1.msra.mxu0 %v3884_v6  ;;  %v999_v61 = vsel %vm993_vm4, %v990_v42, %v992_v43 }
 0x1bc   : > { %3020 = vmatmul.mubr.msk.f32.gmra.mrb[10].mxu1 %vm626_vm3, %v582_v35  ;;  %712 = vmatprep.mubr.f32.mxu0 %v3612_v1 }
 0x1bd   : > { %3173 = vmatprep.subr.bf16.mxu0 %v3172_v46  ;;  %3028 = vmatprep.mubr.msk.f32.mxu1 %vm3611_vm0, %v3612_v1 }
 0x1be   : > { %v988_v50 = vpop.permute.xlu0 %987  ;;  %v3390_v51 = vpop.permute.xlu1 %3389  ;;  %2871 = vmatmul.mubr.msk.f32.gmra.mrb[10].mxu0 %vm626_vm3, %v582_v35  ;;  %3176 = vmatprep.subr.bf16.mxu1 %v3610_v0 }
 0x1bf   : > { %872 = vmatprep.mubr.f32.mxu0 %v3612_v1  ;;  %v3392_v55 = vunpack.i.h.bf16 %v3390_v51  ;;  %v3391_v56 = vunpack.i.l.bf16 %v3390_v51  ;;  %v998_v62 = vsel %vm993_vm4, %v988_v50, %v990_v42 }
 0x1c0   : > { %3029 = vmatmul.mubr.msk.f32.vlgmr.msra.gmra.mrb[12].mxu1 %vm626_vm3, %v576_v47 }
 0x1c1   : > { %3178 = vmatpush3.bf16.msra.mxu1 %v3177_v52  ;;  %3031 = vmatprep.mubr.msk.f32.mxu1 %vm3611_vm0, %v3612_v1  ;;  %v1214_v12 = vsel %vm1212_vm5, %v3391_v56, %v3392_v55 }
 0x1c2   : > { %v3395_v57 = vpop.permute.xlu0 %3394  ;;  %v3400_v58 = vpop.permute.xlu1 %3399  ;;  %2875 = vmatmul.mubr.msk.f32.vlgmr.msra.gmra.mrb[6].mxu0 %vm626_vm3, %v576_v47  ;;  %3041 = vmatprep.subr.mxu1 %v3612_v1 }
 0x1c3   : > { %v3397_v59 = vunpack.i.h.bf16 %v3395_v57  ;;  %v3396_v60 = vunpack.i.l.bf16 %v3395_v57  ;;  %3175 = vmatpush1.bf16.msra.mxu0 %v3174_v53  ;;  %878 = vmatprep.mubr.f32.mxu0 %v3612_v1  ;;  %v3402_v2 = vunpack.i.h.bf16 %v3400_v58  ;;  %v3401_v6 = vunpack.i.l.bf16 %v3400_v58  ;;  %v1410_v57 = vld [vmem:[#allocation6 + $0x60] sm:$0xff] }
 0x1c4   : > { %1022 = vmatprep.subr.mxu0 %v999_v61  ;;  %3032 = vmatmul.mubr.msk.f32.gmra.mrb[14].mxu1 %vm626_vm3, %v577_v54 }
 0x1c5   : > { %3042 = vmatpush3.msra.mxu1 %v992_v43  ;;  %3034 = vmatprep.mubr.msk.f32.mxu1 %vm3611_vm0, %v3612_v1  ;;  %v1216_v13 = vsel %vm1212_vm5, %v3396_v60, %v3397_v59  ;;  %v1215_v16 = vsel %vm1212_vm5, %v3402_v2, %v3396_v60  ;;  %v1213_v17 = vsel %vm1212_vm5, %v3401_v6, %v3391_v56  ;;  %v1411_v2 = vld [vmem:[#allocation6 + $0x68] sm:$0xff] }
 0x1c6   : > { %v1209_v10 = vpop.permute.xlu0 %1208  ;;  %v1211_v11 = vpop.permute.xlu1 %1210  ;;  %2876 = vmatmul.mubr.msk.f32.gmra.mrb[8].mxu0 %vm626_vm3, %v577_v54  ;;  %3183 = vmatprep.subr.bf16.mxu1 %v3610_v0  ;;  %v3179_v14 = vpack.c.bf16 %v1216_v13, %v1214_v12  ;;  %v3184_v19 = vpack.c.bf16 %v3397_v59, %v3392_v55  ;;  %v3181_v8 = vpack.c.bf16 %v1215_v16, %v1213_v17  ;;  %v1412_v17 = vld [vmem:[#allocation6 + $0x70] sm:$0xff] }
 0x1c7   : > { %1023 = vmatpush1.msra.mxu0 %v998_v62  ;;  %884 = vmatprep.mubr.f32.mxu0 %v3612_v1  ;;  %v1218_v7 = vsel %vm1212_vm5, %v1209_v10, %v1211_v11 }
 0x1c8   : > { %3035 = vmatmul.mubr.msk.f32.gmra.mrb[16].mxu1 %vm626_vm3, %v578_v63  ;;  %3180 = vmatprep.subr.bf16.mxu0 %v3179_v14 }
 0x1c9   : > { %3043 = vmatprep.mubr.msk.f32.mxu1 %vm3611_vm0, %v3612_v1 }
 0x1ca   : > { %v1207_v3 = vpop.permute.xlu0 %1206  ;;  %v3405_v18 = vpop.permute.xlu1 %3404  ;;  %2877 = vmatmul.mubr.msk.f32.gmra.mrb[10].mxu0 %vm626_vm3, %v578_v63 }
 0x1cb   : > { %1082 = vmatprep.mubr.f32.mxu0 %v3612_v1  ;;  %v3407_v21 = vunpack.i.h.bf16 %v3405_v18  ;;  %v3406_v9 = vunpack.i.l.bf16 %v3405_v18  ;;  %v1217_v25 = vsel %vm1212_vm5, %v1207_v3, %v1209_v10 }
 0x1cc   : > { %3044 = vmatmul.mubr.msk.f32.vlgmr.msra.gmra.mrb[18].mxu1 %vm626_vm3, %v972_v15 }
 0x1cd   : > { %3185 = vmatpush3.bf16.msra.mxu1 %v3184_v19  ;;  %3046 = vmatprep.mubr.msk.f32.mxu1 %vm3611_vm0, %v3612_v1  ;;  %v1433_v30 = vsel %vm1431_vm6, %v3406_v9, %v3407_v21 }
 0x1ce   : > { %v3410_v22 = vpop.permute.xlu0 %3409  ;;  %v3415_v5 = vpop.permute.xlu1 %3414  ;;  %2881 = vmatmul.mubr.msk.f32.vlgmr.msra.gmra.mrb[6].mxu0 %vm626_vm3, %v972_v15  ;;  %3056 = vmatprep.subr.mxu1 %v3612_v1 }
 0x1cf   : > { %v3412_v23 = vunpack.i.h.bf16 %v3410_v22  ;;  %v3411_v24 = vunpack.i.l.bf16 %v3410_v22  ;;  %3182 = vmatpush1.bf16.msra.mxu0 %v3181_v8  ;;  %1088 = vmatprep.mubr.f32.mxu0 %v3612_v1  ;;  %v3417_v4 = vunpack.i.h.bf16 %v3415_v5  ;;  %v3416_v27 = vunpack.i.l.bf16 %v3415_v5  ;;  %v1629_v22 = vld [vmem:[#allocation6 + $0x78] sm:$0xff] }
 0x1d0   : > { %1241 = vmatprep.subr.mxu0 %v1218_v7  ;;  %3047 = vmatmul.mubr.msk.f32.gmra.mrb[20].mxu1 %vm626_vm3, %v973_v20 }
 0x1d1   : > { %3057 = vmatpush3.msra.mxu1 %v1211_v11  ;;  %3049 = vmatprep.mubr.msk.f32.mxu1 %vm3611_vm0, %v3612_v1  ;;  %v1435_v31 = vsel %vm1431_vm6, %v3411_v24, %v3412_v23  ;;  %v1434_v34 = vsel %vm1431_vm6, %v3417_v4, %v3411_v24  ;;  %v1432_v36 = vsel %vm1431_vm6, %v3416_v27, %v3406_v9  ;;  %v1630_v4 = vld [vmem:[#allocation6 + $0x80] sm:$0xff] }
 0x1d2   : > { %v1428_v28 = vpop.permute.xlu0 %1427  ;;  %v1430_v29 = vpop.permute.xlu1 %1429  ;;  %2882 = vmatmul.mubr.msk.f32.gmra.mrb[8].mxu0 %vm626_vm3, %v973_v20  ;;  %3190 = vmatprep.subr.bf16.mxu1 %v3610_v0  ;;  %v3186_v32 = vpack.c.bf16 %v1435_v31, %v1433_v30  ;;  %v3191_v40 = vpack.c.bf16 %v3412_v23, %v3407_v21  ;;  %v3188_v35 = vpack.c.bf16 %v1434_v34, %v1432_v36  ;;  %v1631_v36 = vld [vmem:[#allocation6 + $0x88] sm:$0xff] }
 0x1d3   : > { %1242 = vmatpush1.msra.mxu0 %v1217_v25  ;;  %1094 = vmatprep.mubr.f32.mxu0 %v3612_v1  ;;  %v1437_v47 = vsel %vm1431_vm6, %v1428_v28, %v1430_v29 }
 0x1d4   : > { %3050 = vmatmul.mubr.msk.f32.gmra.mrb[22].mxu1 %vm626_vm3, %v974_v26  ;;  %3187 = vmatprep.subr.bf16.mxu0 %v3186_v32 }
 0x1d5   : > { %3058 = vmatprep.mubr.msk.f32.mxu1 %vm3611_vm0, %v3612_v1 }
 0x1d6   : > { %v1426_v37 = vpop.permute.xlu0 %1425  ;;  %v3420_v39 = vpop.permute.xlu1 %3419  ;;  %2883 = vmatmul.mubr.msk.f32.gmra.mrb[10].mxu0 %vm626_vm3, %v974_v26 }
 0x1d7   : > { %1301 = vmatprep.mubr.f32.mxu0 %v3612_v1  ;;  %v3422_v41 = vunpack.i.h.bf16 %v3420_v39  ;;  %v3421_v42 = vunpack.i.l.bf16 %v3420_v39  ;;  %v1436_v48 = vsel %vm1431_vm6, %v1426_v37, %v1428_v28 }
 0x1d8   : > { %3059 = vmatmul.mubr.msk.f32.vlgmr.msra.gmra.mrb[24].mxu1 %vm626_vm3, %v1191_v33 }
 0x1d9   : > { %3192 = vmatpush3.bf16.msra.mxu1 %v3191_v40  ;;  %3061 = vmatprep.mubr.msk.f32.mxu1 %vm3611_vm0, %v3612_v1  ;;  %v1652_v54 = vsel %vm1650_vm7, %v3421_v42, %v3422_v41 }
 0x1da   : > { %v3425_v43 = vpop.permute.xlu0 %3424  ;;  %v3430_v44 = vpop.permute.xlu1 %3429  ;;  %2887 = vmatmul.mubr.msk.f32.vlgmr.msra.gmra.mrb[6].mxu0 %vm626_vm3, %v1191_v33  ;;  %3071 = vmatprep.subr.mxu1 %v3612_v1 }
 0x1db   : > { %v3427_v45 = vunpack.i.h.bf16 %v3425_v43  ;;  %v3426_v46 = vunpack.i.l.bf16 %v3425_v43  ;;  %3189 = vmatpush1.bf16.msra.mxu0 %v3188_v35  ;;  %1307 = vmatprep.mubr.f32.mxu0 %v3612_v1  ;;  %v3432_v50 = vunpack.i.h.bf16 %v3430_v44  ;;  %v3431_v51 = vunpack.i.l.bf16 %v3430_v44  ;;  %v1848_v43 = vld [vmem:[#allocation6 + $0x90] sm:$0xff] }
 0x1dc   : > { %1460 = vmatprep.subr.mxu0 %v1437_v47  ;;  %3062 = vmatmul.mubr.msk.f32.gmra.mrb[26].mxu1 %vm626_vm3, %v1192_v38 }
 0x1dd   : > { %3072 = vmatpush3.msra.mxu1 %v1430_v29  ;;  %3064 = vmatprep.mubr.msk.f32.mxu1 %vm3611_vm0, %v3612_v1  ;;  %v1654_v55 = vsel %vm1650_vm7, %v3426_v46, %v3427_v45  ;;  %v1653_v58 = vsel %vm1650_vm7, %v3432_v50, %v3426_v46  ;;  %v1651_v59 = vsel %vm1650_vm7, %v3431_v51, %v3421_v42  ;;  %v1849_v50 = vld [vmem:[#allocation6 + $0x98] sm:$0xff] }
 0x1de   : > { %v1647_v52 = vpop.permute.xlu0 %1646  ;;  %v1649_v53 = vpop.permute.xlu1 %1648  ;;  %2888 = vmatmul.mubr.msk.f32.gmra.mrb[8].mxu0 %vm626_vm3, %v1192_v38  ;;  %3197 = vmatprep.subr.bf16.mxu1 %v3610_v0  ;;  %v3193_v56 = vpack.c.bf16 %v1654_v55, %v1652_v54  ;;  %v3198_v62 = vpack.c.bf16 %v3427_v45, %v3422_v41  ;;  %v3195_v63 = vpack.c.bf16 %v1653_v58, %v1651_v59  ;;  %v1850_v59 = vld [vmem:[#allocation6 + $0xa0] sm:$0xff] }
 0x1df   : > { %1461 = vmatpush1.msra.mxu0 %v1436_v48  ;;  %1313 = vmatprep.mubr.f32.mxu0 %v3612_v1  ;;  %v1656_v15 = vsel %vm1650_vm7, %v1647_v52, %v1649_v53 }
 0x1e0   : > { %3065 = vmatmul.mubr.msk.f32.gmra.mrb[28].mxu1 %vm626_vm3, %v1193_v49  ;;  %3194 = vmatprep.subr.bf16.mxu0 %v3193_v56 }
 0x1e1   : > { %3073 = vmatprep.mubr.msk.f32.mxu1 %vm3611_vm0, %v3612_v1 }
 0x1e2   : > { %v1645_v60 = vpop.permute.xlu0 %1644  ;;  %v3435_v61 = vpop.permute.xlu1 %3434  ;;  %2889 = vmatmul.mubr.msk.f32.gmra.mrb[10].mxu0 %vm626_vm3, %v1193_v49 }
 0x1e3   : > { %1520 = vmatprep.mubr.f32.mxu0 %v3612_v1  ;;  %v3437_v6 = vunpack.i.h.bf16 %v3435_v61  ;;  %v3436_v10 = vunpack.i.l.bf16 %v3435_v61  ;;  %v1655_v16 = vsel %vm1650_vm7, %v1645_v60, %v1647_v52 }
 0x1e4   : > { %3074 = vmatmul.mubr.msk.f32.vlgmr.msra.gmra.mrb[30].mxu1 %vm626_vm3, %v1410_v57 }
 0x1e5   : > { %3199 = vmatpush3.bf16.msra.mxu1 %v3198_v62  ;;  %3076 = vmatprep.mubr.msk.f32.mxu1 %vm3611_vm0, %v3612_v1  ;;  %v1871_v20 = vsel %vm1869_vm8, %v3436_v10, %v3437_v6 }
 0x1e6   : > { %v3440_v11 = vpop.permute.xlu0 %3439  ;;  %v3445_v12 = vpop.permute.xlu1 %3444  ;;  %2893 = vmatmul.mubr.msk.f32.vlgmr.msra.gmra.mrb[6].mxu0 %vm626_vm3, %v1410_v57  ;;  %3086 = vmatprep.subr.mxu1 %v3612_v1 }
 0x1e7   : > { %v3442_v13 = vunpack.i.h.bf16 %v3440_v11  ;;  %v3441_v14 = vunpack.i.l.bf16 %v3440_v11  ;;  %3196 = vmatpush1.bf16.msra.mxu0 %v3195_v63  ;;  %1526 = vmatprep.mubr.f32.mxu0 %v3612_v1  ;;  %v3447_v3 = vunpack.i.h.bf16 %v3445_v12  ;;  %v3446_v18 = vunpack.i.l.bf16 %v3445_v12 }
 0x1e8   : > { %1679 = vmatprep.subr.mxu0 %v1656_v15  ;;  %3077 = vmatmul.mubr.msk.f32.gmra.mrb[32].mxu1 %vm626_vm3, %v1411_v2  ;;  %v2068_v15 = vld [vmem:[#allocation6 + $0xb0] sm:$0xff] }
 0x1e9   : > { %3087 = vmatpush3.msra.mxu1 %v1649_v53  ;;  %3079 = vmatprep.mubr.msk.f32.mxu1 %vm3611_vm0, %v3612_v1  ;;  %v1873_v21 = vsel %vm1869_vm8, %v3441_v14, %v3442_v13  ;;  %v1872_v5 = vsel %vm1869_vm8, %v3447_v3, %v3441_v14  ;;  %v1870_v23 = vsel %vm1869_vm8, %v3446_v18, %v3436_v10  ;;  %v2067_v10 = vld [vmem:[#allocation6 + $0xa8] sm:$0xff]  ;;  %v2069_v3 = vld [vmem:[#allocation6 + $0xb8] sm:$0xff] }
 0x1ea   : > { %v1866_v19 = vpop.permute.xlu0 %1865  ;;  %v1868_v8 = vpop.permute.xlu1 %1867  ;;  %2894 = vmatmul.mubr.msk.f32.gmra.mrb[8].mxu0 %vm626_vm3, %v1411_v2  ;;  %3204 = vmatprep.subr.bf16.mxu1 %v3610_v0  ;;  %v3200_v9 = vpack.c.bf16 %v1873_v21, %v1871_v20  ;;  %v3205_v25 = vpack.c.bf16 %v3442_v13, %v3437_v6  ;;  %v3202_v26 = vpack.c.bf16 %v1872_v5, %v1870_v23  ;;  %v2288_v20 = vld [vmem:[#allocation6 + $0xd0] sm:$0xff]  ;;  %v4161_v21 = vld [vmem:[%s4239_s6] sm:$0xff] }
 0x1eb   : > { %1680 = vmatpush1.msra.mxu0 %v1655_v16  ;;  %1532 = vmatprep.mubr.f32.mxu0 %v3612_v1  ;;  %v1875_v33 = vsel %vm1869_vm8, %v1866_v19, %v1868_v8 }
 0x1ec   : > { %3080 = vmatmul.mubr.msk.f32.gmra.mrb[34].mxu1 %vm626_vm3, %v1412_v17  ;;  %3201 = vmatprep.subr.bf16.mxu0 %v3200_v9 }
 0x1ed   : > { %3088 = vmatprep.mubr.msk.f32.mxu1 %vm3611_vm0, %v3612_v1 }
 0x1ee   : > { %v1864_v24 = vpop.permute.xlu0 %1863  ;;  %v3450_v7 = vpop.permute.xlu1 %3449  ;;  %2895 = vmatmul.mubr.msk.f32.gmra.mrb[10].mxu0 %vm626_vm3, %v1412_v17 }
 0x1ef   : > { %1739 = vmatprep.mubr.f32.mxu0 %v3612_v1  ;;  %v3452_v27 = vunpack.i.h.bf16 %v3450_v7  ;;  %v3451_v28 = vunpack.i.l.bf16 %v3450_v7  ;;  %v1874_v34 = vsel %vm1869_vm8, %v1864_v24, %v1866_v19  ;;  %v2286_v19 = vld [vmem:[#allocation6 + $0xc0] sm:$0xff] }
 0x1f0   : > { %3089 = vmatmul.mubr.msk.f32.vlgmr.msra.gmra.mrb[36].mxu1 %vm626_vm3, %v1629_v22 }
 0x1f1   : > { %3206 = vmatpush3.bf16.msra.mxu1 %v3205_v25  ;;  %3091 = vmatprep.mubr.msk.f32.mxu1 %vm3611_vm0, %v3612_v1  ;;  %v2090_v38 = vsel %vm2088_vm9, %v3451_v28, %v3452_v27 }
 0x1f2   : > { %v3455_v29 = vpop.permute.xlu0 %3454  ;;  %v3460_v30 = vpop.permute.xlu1 %3459  ;;  %2899 = vmatmul.mubr.msk.f32.vlgmr.msra.gmra.mrb[6].mxu0 %vm626_vm3, %v1629_v22  ;;  %3101 = vmatprep.subr.mxu1 %v3612_v1 }
 0x1f3   : > { %v3457_v31 = vunpack.i.h.bf16 %v3455_v29  ;;  %v3456_v32 = vunpack.i.l.bf16 %v3455_v29  ;;  %3203 = vmatpush1.bf16.msra.mxu0 %v3202_v26  ;;  %1745 = vmatprep.mubr.f32.mxu0 %v3612_v1  ;;  %v3462_v37 = vunpack.i.h.bf16 %v3460_v30  ;;  %v3461_v39 = vunpack.i.l.bf16 %v3460_v30 }
 0x1f4   : > { %1898 = vmatprep.subr.mxu0 %v1875_v33  ;;  %3092 = vmatmul.mubr.msk.f32.gmra.mrb[38].mxu1 %vm626_vm3, %v1630_v4 }
 0x1f5   : > { %3102 = vmatpush3.msra.mxu1 %v1868_v8  ;;  %3094 = vmatprep.mubr.msk.f32.mxu1 %vm3611_vm0, %v3612_v1  ;;  %v2092_v41 = vsel %vm2088_vm9, %v3456_v32, %v3457_v31  ;;  %v2091_v44 = vsel %vm2088_vm9, %v3462_v37, %v3456_v32  ;;  %v2089_v45 = vsel %vm2088_vm9, %v3461_v39, %v3451_v28  ;;  %v2287_v8 = vld [vmem:[#allocation6 + $0xc8] sm:$0xff] }
 0x1f6   : > { %v2085_v40 = vpop.permute.xlu0 %2084  ;;  %v2087_v35 = vpop.permute.xlu1 %2086  ;;  %2900 = vmatmul.mubr.msk.f32.gmra.mrb[8].mxu0 %vm626_vm3, %v1630_v4  ;;  %3211 = vmatprep.subr.bf16.mxu1 %v3610_v0  ;;  %v3207_v42 = vpack.c.bf16 %v2092_v41, %v2090_v38  ;;  %v3212_v48 = vpack.c.bf16 %v3457_v31, %v3452_v27  ;;  %v3209_v49 = vpack.c.bf16 %v2091_v44, %v2089_v45 }
 0x1f7   : > { %1899 = vmatpush1.msra.mxu0 %v1874_v34  ;;  %1751 = vmatprep.mubr.f32.mxu0 %v3612_v1  ;;  %v2094_v57 = vsel %vm2088_vm9, %v2085_v40, %v2087_v35 }
 0x1f8   : > { %3095 = vmatmul.mubr.msk.f32.gmra.mrb[40].mxu1 %vm626_vm3, %v1631_v36  ;;  %3208 = vmatprep.subr.bf16.mxu0 %v3207_v42 }
 0x1f9   : > { %3103 = vmatprep.mubr.msk.f32.mxu1 %vm3611_vm0, %v3612_v1 }
 0x1fa   : > { %v2083_v46 = vpop.permute.xlu0 %2082  ;;  %v3465_v47 = vpop.permute.xlu1 %3464  ;;  %2901 = vmatmul.mubr.msk.f32.gmra.mrb[10].mxu0 %vm626_vm3, %v1631_v36 }
 0x1fb   : > { %1958 = vmatprep.mubr.f32.mxu0 %v3612_v1  ;;  %v3467_v51 = vunpack.i.h.bf16 %v3465_v47  ;;  %v3466_v52 = vunpack.i.l.bf16 %v3465_v47  ;;  %v2093_v58 = vsel %vm2088_vm9, %v2083_v46, %v2085_v40 }
 0x1fc   : > { %3104 = vmatmul.mubr.msk.f32.vlgmr.msra.gmra.mrb[42].mxu1 %vm626_vm3, %v1848_v43 }
 0x1fd   : > { %3213 = vmatpush3.bf16.msra.mxu1 %v3212_v48  ;;  %3106 = vmatprep.mubr.msk.f32.mxu1 %vm3611_vm0, %v3612_v1  ;;  %v2309_v62 = vsel %vm2307_vm10, %v3466_v52, %v3467_v51 }
 0x1fe   : > { %v3470_v53 = vpop.permute.xlu0 %3469  ;;  %2905 = vmatmul.mubr.msk.f32.vlgmr.msra.gmra.mrb[6].mxu0 %vm626_vm3, %v1848_v43  ;;  %3116 = vmatprep.subr.mxu1 %v3612_v1  ;;  %v3475_v56 = vpop.permute.xlu1 %3474 }
 0x1ff   : > { %v3472_v54 = vunpack.i.h.bf16 %v3470_v53  ;;  %v3471_v55 = vunpack.i.l.bf16 %v3470_v53  ;;  %3210 = vmatpush1.bf16.msra.mxu0 %v3209_v49  ;;  %1964 = vmatprep.mubr.f32.mxu0 %v3612_v1  ;;  %v3477_v60 = vunpack.i.h.bf16 %v3475_v56  ;;  %v3476_v61 = vunpack.i.l.bf16 %v3475_v56 }
 0x200   : > { %2117 = vmatprep.subr.mxu0 %v2094_v57  ;;  %3107 = vmatmul.mubr.msk.f32.gmra.mrb[44].mxu1 %vm626_vm3, %v1849_v50 }
 0x201   : > { %3117 = vmatpush3.msra.mxu1 %v2087_v35  ;;  %3109 = vmatprep.mubr.msk.f32.mxu1 %vm3611_vm0, %v3612_v1  ;;  %v2311_v63 = vsel %vm2307_vm10, %v3471_v55, %v3472_v54  ;;  %v2310_v11 = vsel %vm2307_vm10, %v3477_v60, %v3471_v55  ;;  %v2308_v12 = vsel %vm2307_vm10, %v3476_v61, %v3466_v52 }
 0x202   : > { %2906 = vmatmul.mubr.msk.f32.gmra.mrb[8].mxu0 %vm626_vm3, %v1849_v50  ;;  %3218 = vmatprep.subr.bf16.mxu1 %v3610_v0  ;;  %v3214_v2 = vpack.c.bf16 %v2311_v63, %v2309_v62  ;;  %v2304_v6 = vpop.permute.xlu0 %2303  ;;  %v3219_v13 = vpack.c.bf16 %v3472_v54, %v3467_v51  ;;  %v2306_v0 = vpop.permute.xlu1 %2305  ;;  %v3216_v14 = vpack.c.bf16 %v2310_v11, %v2308_v12 }
 0x203   : > { %2118 = vmatpush1.msra.mxu0 %v2093_v58  ;;  %1970 = vmatprep.mubr.f32.mxu0 %v3612_v1  ;;  %v2313_v17 = vsel %vm2307_vm10, %v2304_v6, %v2306_v0 }
 0x204   : > { %3110 = vmatmul.mubr.msk.f32.gmra.mrb[46].mxu1 %vm626_vm3, %v1850_v59  ;;  %3215 = vmatprep.subr.bf16.mxu0 %v3214_v2 }
 0x205   : > { %3118 = vmatprep.mubr.msk.f32.mxu1 %vm3611_vm0, %v3612_v1 }
 0x206   : > { %2907 = vmatmul.mubr.msk.f32.gmra.mrb[10].mxu0 %vm626_vm3, %v1850_v59  ;;  %v2302_v16 = vpop.permute.xlu0 %2301 }
 0x207   : > { %2177 = vmatprep.mubr.f32.mxu0 %v3612_v1  ;;  %v2312_v18 = vsel %vm2307_vm10, %v2302_v16, %v2304_v6 }
 0x208   : > { %3119 = vmatmul.mubr.msk.f32.vlgmr.msra.gmra.mrb[48].mxu1 %vm626_vm3, %v2067_v10 }
 0x209   : > { %3220 = vmatpush3.bf16.msra.mxu1 %v3219_v13  ;;  %3121 = vmatprep.mubr.msk.f32.mxu1 %vm3611_vm0, %v3612_v1 }
 0x20a   : > { %2911 = vmatmul.mubr.msk.f32.vlgmr.msra.gmra.mrb[6].mxu0 %vm626_vm3, %v2067_v10  ;;  %3131 = vmatprep.subr.mxu1 %v3612_v1 }
 0x20b   : > { %3217 = vmatpush1.bf16.msra.mxu0 %v3216_v14  ;;  %2183 = vmatprep.mubr.f32.mxu0 %v3612_v1 }
 0x20c   : > { %2336 = vmatprep.subr.mxu0 %v2313_v17  ;;  %3122 = vmatmul.mubr.msk.f32.gmra.mrb[50].mxu1 %vm626_vm3, %v2068_v15 }
 0x20d   : > { %3132 = vmatpush3.msra.mxu1 %v2306_v0  ;;  %3124 = vmatprep.mubr.msk.f32.mxu1 %vm3611_vm0, %v3612_v1 }
 0x20e   : > { %2912 = vmatmul.mubr.msk.f32.gmra.mrb[8].mxu0 %vm626_vm3, %v2068_v15 }
 0x20f   : > { %2337 = vmatpush1.msra.mxu0 %v2312_v18  ;;  %2189 = vmatprep.mubr.f32.mxu0 %v3612_v1 }
 0x210   : > { %3125 = vmatmul.mubr.msk.f32.gmra.mrb[52].mxu1 %vm626_vm3, %v2069_v3 }
 0x211   : > { %3133 = vmatprep.mubr.msk.f32.mxu1 %vm3611_vm0, %v3612_v1 }
 0x212   : > { %2913 = vmatmul.mubr.msk.f32.gmra.mrb[10].mxu0 %vm626_vm3, %v2069_v3 }
 0x213   : > { %2396 = vmatprep.mubr.f32.mxu0 %v3612_v1 }
 0x214   : > { %3134 = vmatmul.mubr.msk.f32.vlgmr.msra.gmra.mrb[54].mxu1 %vm626_vm3, %v2286_v19 }
 0x215   : > { %3136 = vmatprep.mubr.msk.f32.mxu1 %vm3611_vm0, %v3612_v1 }
 0x216   : > { %2917 = vmatmul.mubr.msk.f32.vlgmr.msra.gmra.mrb[6].mxu0 %vm626_vm3, %v2286_v19 }
 0x217   : > { %2402 = vmatprep.mubr.f32.mxu0 %v3612_v1 }
 0x218   : > { %3137 = vmatmul.mubr.msk.f32.gmra.mrb[56].mxu1 %vm626_vm3, %v2287_v8 }
 0x219   : > { %3139 = vmatprep.mubr.msk.f32.mxu1 %vm3611_vm0, %v3612_v1 }
 0x21a   : > { %2918 = vmatmul.mubr.msk.f32.gmra.mrb[8].mxu0 %vm626_vm3, %v2287_v8 }
 0x21b   : > { %2408 = vmatprep.mubr.f32.mxu0 %v3612_v1 }
 0x21c   : > { %3140 = vmatmul.mubr.msk.f32.gmra.mrb[58].mxu1 %vm626_vm3, %v2288_v20 }
 0x21d   : > { %3148 = vmatprep.mubr.msk.f32.mxu1 %vm626_vm3, %v4161_v21 }
 0x21e   : > { %2919 = vmatmul.mubr.msk.f32.gmra.mrb[10].mxu0 %vm626_vm3, %v2288_v20 }
 0x21f   : > { %2615 = vmatprep.mubr.f32.mxu0 %v3612_v1 }
 0x287   : > { %v785_v9 = vpop.f32.mrb[6].mxu1 }
 0x288   : > { %v3015_v22 = vpop.f32.mrb[7].mxu1 }
 0x28b   : > { %v790_v5 = vpop.f32.mrb[8].mxu1 }
 0x28c   : > { %v3018_v23 = vpop.f32.mrb[9].mxu1 }
 0x28f   : > { %v795_v24 = vpop.f32.mrb[10].mxu1 }
 0x290   : > { %v3021_v7 = vpop.f32.mrb[11].mxu1 }
 0x293   : > { %v957_v25 = vpop.f32.mrb[12].mxu1 }
 0x294   : > { %v958_v26 = vadd.f32 %v957_v25, %v785_v9  ;;  %v3030_v4 = vpop.f32.mrb[13].mxu1 }
 0x297   : > { %v962_v27 = vpop.f32.mrb[14].mxu1 }
 0x298   : > { %v963_v28 = vadd.f32 %v962_v27, %v790_v5  ;;  %v3033_v29 = vpop.f32.mrb[15].mxu1 }
 0x29b   : > { %v967_v30 = vpop.f32.mrb[16].mxu1 }
 0x29c   : > { %v968_v31 = vadd.f32 %v967_v30, %v795_v24  ;;  %v3036_v32 = vpop.f32.mrb[17].mxu1  ;;  %v2510_v30 = vpop.permute.xlu1 %2509 }
 0x29f   : > { %v1167_v33 = vpop.f32.mrb[18].mxu1 }
 0x2a0   : > { %v1183_v34 = vadd.f32 %v1167_v33, %v958_v26  ;;  %v3045_v36 = vpop.f32.mrb[19].mxu1 }
 0x2a3   : > { %v1172_v37 = vpop.f32.mrb[20].mxu1 }
 0x2a4   : > { %v1186_v39 = vadd.f32 %v1172_v37, %v963_v28  ;;  %v3048_v40 = vpop.f32.mrb[21].mxu1 }
 0x2a7   : > { %v1177_v35 = vpop.f32.mrb[22].mxu1 }
 0x2a8   : > { %v1189_v38 = vadd.f32 %v1177_v35, %v968_v31  ;;  %v3051_v41 = vpop.f32.mrb[23].mxu1 }
 0x2ab   : > { %v1386_v42 = vpop.f32.mrb[24].mxu1 }
 0x2ac   : > { %v1402_v43 = vadd.f32 %v1386_v42, %v1183_v34  ;;  %v3060_v44 = vpop.f32.mrb[25].mxu1  ;;  %v2515_v34 = vpop.permute.xlu0 %2514 }
 0x2af   : > { %v1391_v45 = vpop.f32.mrb[26].mxu1 }
 0x2b0   : > { %v1405_v46 = vadd.f32 %v1391_v45, %v1186_v39  ;;  %v3063_v47 = vpop.f32.mrb[27].mxu1 }
 0x2b3   : > { %v1396_v48 = vpop.f32.mrb[28].mxu1 }
 0x2b4   : > { %v1408_v49 = vadd.f32 %v1396_v48, %v1189_v38  ;;  %v3066_v50 = vpop.f32.mrb[29].mxu1  ;;  %v2520_v48 = vpop.permute.xlu1 %2519 }
 0x2b7   : > { %v1605_v51 = vpop.f32.mrb[30].mxu1 }
 0x2b8   : > { %v1621_v52 = vadd.f32 %v1605_v51, %v1402_v43  ;;  %v3075_v53 = vpop.f32.mrb[31].mxu1 }
 0x2bb   : > { %v1610_v54 = vpop.f32.mrb[32].mxu1 }
 0x2bc   : > { %v1624_v55 = vadd.f32 %v1610_v54, %v1405_v46  ;;  %v3078_v56 = vpop.f32.mrb[33].mxu1  ;;  %v2532_v54 = vld [vmem:[%s4239_s6 + $0x8] sm:$0xff] }
 0x2bd   : > { %v2543_v56 = vpop.permute.xlu1 %2542 }
 0x2bf   : > { %v1615_v57 = vpop.f32.mrb[34].mxu1 }
 0x2c0   : > { %v1627_v58 = vadd.f32 %v1615_v57, %v1408_v49  ;;  %v3081_v59 = vpop.f32.mrb[35].mxu1  ;;  %v2538_v57 = vpop.permute.xlu0 %2537 }
 0x2c3   : > { %v1824_v60 = vpop.f32.mrb[36].mxu1 }
 0x2c4   : > { %v1840_v61 = vadd.f32 %v1824_v60, %v1621_v52  ;;  %v3090_v62 = vpop.f32.mrb[37].mxu1  ;;  %v2722_v59 = vpop.permute.xlu0 %2721 }
 0x2c7   : > { %v1829_v63 = vpop.f32.mrb[38].mxu1 }
 0x2c8   : > { %v1843_v2 = vadd.f32 %v1829_v63, %v1624_v55  ;;  %v3093_v6 = vpop.f32.mrb[39].mxu1 }
 0x2cb   : > { %v1834_v10 = vpop.f32.mrb[40].mxu1 }
 0x2cc   : > { %v1846_v11 = vadd.f32 %v1834_v10, %v1627_v58  ;;  %v3096_v12 = vpop.f32.mrb[41].mxu1  ;;  %v2724_v58 = vpop.permute.xlu1 %2723 }
 0x2cf   : > { %v2043_v13 = vpop.f32.mrb[42].mxu1 }
 0x2d0   : > { %v2059_v0 = vadd.f32 %v2043_v13, %v1840_v61  ;;  %v3105_v14 = vpop.f32.mrb[43].mxu1  ;;  %v2728_v60 = vpop.permute.xlu1 %2727 }
 0x2d3   : > { %v2048_v15 = vpop.f32.mrb[44].mxu1 }
 0x2d4   : > { %v2062_v16 = vadd.f32 %v2048_v15, %v1843_v2  ;;  %v3108_v17 = vpop.f32.mrb[45].mxu1  ;;  %v2732_v14 = vpop.permute.xlu1 %2731 }
 0x2d7   : > { %v2053_v3 = vpop.f32.mrb[46].mxu1 }
 0x2d8   : > { %v2065_v18 = vadd.f32 %v2053_v3, %v1846_v11  ;;  %v3111_v19 = vpop.f32.mrb[47].mxu1 }
 0x2db   : > { %v2262_v8 = vpop.f32.mrb[48].mxu1 }
 0x2dc   : > { %v2278_v20 = vadd.f32 %v2262_v8, %v2059_v0  ;;  %v3120_v9 = vpop.f32.mrb[49].mxu1 }
 0x2df   : > { %v2267_v22 = vpop.f32.mrb[50].mxu1 }
 0x2e0   : > { %v2281_v5 = vadd.f32 %v2267_v22, %v2062_v16  ;;  %v3123_v23 = vpop.f32.mrb[51].mxu1 }
 0x2e3   : > { %v2272_v24 = vpop.f32.mrb[52].mxu1 }
 0x2e4   : > { %v2284_v7 = vadd.f32 %v2272_v24, %v2065_v18  ;;  %v3126_v25 = vpop.f32.mrb[53].mxu1 }
 0x2e7   : > { %v2481_v26 = vpop.f32.mrb[54].mxu1 }
 0x2e8   : > { %v2497_v4 = vadd.f32 %v2481_v26, %v2278_v20  ;;  %v3135_v27 = vpop.f32.mrb[55].mxu1  ;;  %v2733_v20 = vsel %vm1431_vm6, %v2722_v59, %v2724_v58 }
 0x2e9   : > { %v2398_v28 = vpop.f32.mrb[6].mxu0 }
 0x2ea   : > { %v2400_v29 = vpop.f32.mrb[7].mxu0  ;;  %v2524_v37 = vadd.f32 %v2510_v30, %v2497_v4  ;;  %v2522_v39 = vadd.f32 %v2510_v30, %v2398_v28 }
 0x2eb   : > { %v2486_v31 = vpop.f32.mrb[56].mxu1  ;;  %v2523_v41 = vadd.f32 %v2510_v30, %v2400_v29 }
 0x2ec   : > { %v2500_v32 = vadd.f32 %v2486_v31, %v2281_v5  ;;  %v3138_v33 = vpop.f32.mrb[57].mxu1 }
 0x2ed   : > { %v2404_v36 = vpop.f32.mrb[8].mxu0 }
 0x2ee   : > { %v2527_v40 = vadd.f32 %v2515_v34, %v2500_v32  ;;  %v2525_v35 = vadd.f32 %v2515_v34, %v2404_v36  ;;  %v2406_v38 = vpop.f32.mrb[9].mxu0 }
 0x2ef   : > { %v2526_v42 = vadd.f32 %v2515_v34, %v2406_v38  ;;  %v2491_v43 = vpop.f32.mrb[58].mxu1 }
 0x2f0   : > { %v3223_v44 = vpack.c.bf16 %v2525_v35, %v2522_v39  ;;  %v2503_v45 = vadd.f32 %v2491_v43, %v2284_v7  ;;  %v3225_v46 = vpack.c.bf16 %v2527_v40, %v2524_v37  ;;  %v3141_v47 = vpop.f32.mrb[59].mxu1 }
 0x2f1   : > { %v3221_v49 = vpack.c.bf16 %v2526_v42, %v2523_v41  ;;  %v2410_v50 = vpop.f32.mrb[10].mxu0 }
 0x2f2   : > { %v2530_v51 = vadd.f32 %v2520_v48, %v2503_v45  ;;  %v2412_v52 = vpop.f32.mrb[11].mxu0  ;;  %3226 = vmatprep.subr.bf16.mxu1 %v3225_v46  ;;  %v2528_v55 = vadd.f32 %v2520_v48, %v2410_v50 }
 0x2f3   : > { %v2529_v53 = vadd.f32 %v2520_v48, %v2412_v52  ;;  %3222 = vmatprep.subr.bf16.mxu0 %v3221_v49  ;;  %3228 = vmatpush3.bf16.msra.mxu1 %v3225_v46 }
 0x2f4   : > { %3224 = vmatpush1.bf16.msra.mxu0 %v3223_v44  ;;  %3146 = vmatprep.subr.mxu1 %v2530_v51 }
 0x2f5   : > { %2555 = vmatprep.subr.mxu0 %v2529_v53 }
 0x2f7   : > { %3147 = vmatpush3.msra.mxu1 %v2530_v51 }
 0x2f8   : > { %2556 = vmatpush1.msra.mxu0 %v2528_v55  ;;  %3149 = vmatmul.mubr.msk.f32.vlgmr.msra.gmra.mrb[60].mxu1 %vm626_vm3, %v2532_v54 }
 0x2f9   : > { %2923 = vmatmul.mubr.msk.f32.vlgmr.msra.gmra.mrb[12].mxu0 %vm626_vm3, %v4161_v21  ;;  %v2726_v21 = vpop.permute.xlu0 %2725 }
 0x2fa   : > { %2621 = vmatprep.mubr.f32.mxu0 %v3612_v1  ;;  %v2734_v7 = vsel %vm1431_vm6, %v2724_v58, %v2726_v21 }
 0x2fd   : > { %2924 = vmatmul.mubr.msk.f32.gmra.mrb[14].mxu0 %vm626_vm3, %v2532_v54  ;;  %v2730_v26 = vpop.permute.xlu0 %2729 }
 0x2fe   : > { %v2736_v29 = vsel %vm1431_vm6, %v2730_v26, %v2732_v14  ;;  %v2735_v31 = vsel %vm1431_vm6, %v2728_v60, %v2730_v26 }
 0x3cb   : > { %v3150_v61 = vpop.f32.mrb[60].mxu1 }
 0x3cc   : > { %v2700_v62 = vadd.f32 %v3150_v61, %v2543_v56  ;;  %v2617_v63 = vpop.f32.mrb[12].mxu0  ;;  %v2694_v2 = vpop.f32.mrb[61].mxu1 }
 0x3cd   : > { %v2618_v6 = vadd.f32 %v2617_v63, %v2538_v57  ;;  %v2695_v10 = vadd.f32 %v2694_v2, %v2538_v57  ;;  %v2619_v11 = vpop.f32.mrb[13].mxu0 }
 0x3ce   : > { %v2708_v12 = vmax.f32 %v2700_v62, 0.0  ;;  %v2620_v1 = vadd.f32 %v2619_v11, %v2538_v57 }
 0x3cf   : > { %v2703_v13 = vmax.f32 %v2618_v6, 0.0  ;;  %v2705_v0 = vmax.f32 %v2695_v10, 0.0 }
 0x3d0   : > { %v2714_v15 = vmin.f32 %v2708_v12, 6.0  ;;  %v2704_v16 = vmax.f32 %v2620_v1, 0.0  ;;  %v2623_v17 = vpop.f32.mrb[14].mxu0 }
 0x3d1   : > { %v2709_v3 = vmin.f32 %v2703_v13, 6.0  ;;  %v2711_v18 = vmin.f32 %v2705_v0, 6.0  ;;  %v2624_v19 = vadd.f32 %v2623_v17, %v2543_v56  ;;  %v2625_v8 = vpop.f32.mrb[15].mxu0 }
 0x3d2   : > { %v2710_v9 = vmin.f32 %v2704_v16, 6.0  ;;  %v2748_v22 = vadd.f32 %v2732_v14, %v2714_v15  ;;  %v2626_v5 = vadd.f32 %v2625_v8, %v2543_v56 }
 0x3d3   : > { %v2743_v23 = vadd.f32 %v2733_v20, %v2709_v3  ;;  %v2706_v24 = vmax.f32 %v2624_v19, 0.0  ;;  %v2745_v25 = vadd.f32 %v2726_v21, %v2711_v18 }
 0x3d4   : > { %v2744_v4 = vadd.f32 %v2734_v7, %v2710_v9  ;;  %2755 = vst.msk [vmem:[%s326_s22 + $0x28] sm:$0xff] %vm2751_vm11, %v2748_v22  ;;  %v2707_v27 = vmax.f32 %v2626_v5, 0.0 }
 0x3d5   : > { %2749 = vst [vmem:[%s326_s22] sm:$0xff] %v2743_v23  ;;  %v2712_v28 = vmin.f32 %v2706_v24, 6.0  ;;  %2752 = vst.msk [vmem:[%s326_s22 + $0x10] sm:$0xff] %vm2751_vm11, %v2745_v25 }
 0x3d6   : > { %2750 = vst [vmem:[%s326_s22 + $0x8] sm:$0xff] %v2744_v4  ;;  %v2713_v30 = vmin.f32 %v2707_v27, 6.0 }
 0x3d7   : > { %v2746_v32 = vadd.f32 %v2735_v31, %v2712_v28 }
 0x3d8   : > { %v2747_v33 = vadd.f32 %v2736_v29, %v2713_v30 }
 0x3d9   : > { %2753 = vst [vmem:[%s326_s22 + $0x18] sm:$0xff] %v2746_v32 }
 0x3da   : > { %2754 = vst [vmem:[%s326_s22 + $0x20] sm:$0xff] %v2747_v33 }
 0x3db   : > { %3547 = shalt.err (!%p3544_p11)
}
 0x3dc   : > { %s3548_s26 = scalar_lea.hbm %s4188_s18, 768  ;;  %s3552_s22 = scalar_lea.hbm %s4241_s8, 1536 }
 0x3dd   : > { %p3549_p13 = scmp.ne.s32.totalorder %s4188_s18, %s3548_s26  ;;  %p3553_p5 = scmp.lt.u32.totalorder %s4188_s18, %s4241_s8 }
 0x3de   : > { %p3554_p9 = scmp.lt.u32.totalorder %s3552_s22, %s3548_s26  ;;  %p3556_p12 = scmp.lt.u32.totalorder %s3548_s26, %s4188_s18 }
 0x3df   : > { %p3550_p0 = pnand %p3549_p13, %p4254_p1 }
 0x3e0   : > { %p3555_p10 = por %p3554_p9, %p3553_p5 }
 0x3e1   : > { %p3551_p6 = pneg %p3550_p0 }
 0x3e2   : > { %p3557_p2 = por %p3556_p12, %p3555_p10 }
 0x3e4   : > { %p3558_p3 = pnand %p3557_p2, %p3551_p6 }
 0x3e6   : > { %3561 = shalt.err (!%p3558_p3)
}
 0x3e7   : > { %s3623_s9 = smov 384   ;;  %s3624_s23 = smov 24  }
 0x3e8   : > { %3288 = dma.vmem_to_hbm [thread:$0]  (%p4254_p1), %s4183_s10, 768, %s4188_s18, %s4192_s19, %s3623_s9, %s3623_s9, %s3624_s23  }
 0x3e9 PF: > { %p3305_p4 = scmp.ge.s32.totalorder %s3604_s30, 2  ;;  %s2785_s20 = sand.u32 1, %s3592_s27  }
 0x3ea   : > { %p4255_p7 = scmp.ne.s32.totalorder %s4246_s16, 0  ;;  %s2786_s24 = scalar_lea.sflag [#allocation5], %s2785_s20 }
 0x3ec   : > { %p3298_p8 = pnand %p3305_p4, %p4255_p7 }
 0x3ee   : > { %3587 = dma.done.wait (!%p3298_p8), %s2786_s24, 768  }
 0x3ef   : > { %3589 = vsyncadd (!%p3298_p8), %s2786_s24, 4294966528  ;;  %p20_p11 = scmp.ge.s32.totalorder %s3695_s11, 4   ;;  %s4256_s27 = smov %s3596_s28 }
 0x3f0   : > { %s4257_s28 = smov %s3600_s29  ;;  %s4258_s29 = smov %s3706_s14 }
 0x3f1   : > { %s4259_s30 = smov %s3695_s11  ;;  %22 = sbr.rel (!%p20_p11) target bundleno = 5 (0x5), region = 104 }
 0x3f8   :  { %2791 = vsyncpa [#allocation4], 1 }
 0x3f9   :  { %2793 = vsyncpa [#allocation4 + $0x1], 1 }
 0x3fa   :  { %2794 = vsyncpa [#allocation7], 1 }
 0x3fb   :  { %2795 = vsyncpa [#allocation5], 1 }
 0x3fc   :  { %2797 = vsyncpa [#allocation5 + $0x1], 1 }

</bundles_post_ra>
